<compile_context>
chip_gen: v5e
topology: v5e:2x2
jax: 0.10.0
libtpu: 0.0.40
codegen_flags: <defaults>
</compile_context>

<pallas_src>
import functools

import jax
import jax.numpy as jnp
import numpy as np
from jax import lax
from jax.experimental import pallas as pl
from jax.experimental.pallas import tpu as pltpu


def _plain_block_kernel(
    x_ref,      # (1, Cin, H, W)        bf16
    w_ref,      # (Cout, 9*Cin)         bf16   (rows ordered (kh, kw, cin))
    g_ref,      # (Cout, 1)             f32
    b_ref,      # (Cout, 1)             f32
    o_ref,      # (1, Cout, Ho*Wo)      f32
    conv_buf,   # (N, Cout, Ho*Wo)      f32  scratch: conv result, kept on chip
    sum_ref,    # (Cout, 1)             f32  scratch: per-channel sum
    ssq_ref,    # (Cout, 1)             f32  scratch: per-channel sum of squares
    scale_ref,  # (Cout, 1)             f32  scratch: gamma * rsqrt(var+eps)
    shift_ref,  # (Cout, 1)             f32  scratch: beta - mean*scale
    *, stride, eps, H, W, Ho, Wo, count,
):
    p = pl.program_id(0)   # 0: conv + stats accumulation, 1: BN apply + ReLU + store
    n = pl.program_id(1)   # batch index
    Cin = x_ref.shape[1]

    @pl.when((p == 0) & (n == 0))
    def _init_stats():
        sum_ref[...] = jnp.zeros_like(sum_ref)
        ssq_ref[...] = jnp.zeros_like(ssq_ref)

    @pl.when(p == 0)
    def _conv_phase():
        x = x_ref[0]                                            # (Cin, H, W) bf16
        # Build the 1-pixel zero halo in VMEM (no HBM pad pass in the wrapper).
        zw = jnp.zeros((Cin, H, 1), x.dtype)
        xw = jnp.concatenate([zw, x, zw], axis=2)               # (Cin, H, W+2)
        zh = jnp.zeros((Cin, 1, W + 2), x.dtype)
        xp = jnp.concatenate([zh, xw, zh], axis=1)              # (Cin, H+2, W+2)

        # im2col, tap-major / cin-minor rows -> matches w_ref row ordering.
        taps = []
        for kh in range(3):
            for kw in range(3):
                sl = lax.slice(
                    xp,
                    (0, kh, kw),
                    (Cin, kh + (Ho - 1) * stride + 1, kw + (Wo - 1) * stride + 1),
                    (1, stride, stride),
                )                                               # (Cin, Ho, Wo)
                taps.append(sl.reshape(Cin, Ho * Wo))
        patches = jnp.concatenate(taps, axis=0)                 # (9*Cin, Ho*Wo) bf16

        # Single MXU pass, lane axis = Ho*Wo (lane-dense), f32 accumulation.
        y = jnp.dot(w_ref[...], patches, preferred_element_type=jnp.float32)
        conv_buf[n] = y                                         # (Cout, Ho*Wo) f32

        sum_ref[...] += jnp.sum(y, axis=1, keepdims=True)
        ssq_ref[...] += jnp.sum(y * y, axis=1, keepdims=True)

    @pl.when((p == 1) & (n == 0))
    def _finalize_stats():
        mean = sum_ref[...] / count                             # (Cout, 1)
        var = ssq_ref[...] / count - mean * mean                # biased variance
        inv = lax.rsqrt(var + eps)
        scale_ref[...] = g_ref[...] * inv
        shift_ref[...] = b_ref[...] - mean * g_ref[...] * inv

    @pl.when(p == 1)
    def _bn_relu_phase():
        y = conv_buf[n]                                         # (Cout, Ho*Wo) f32
        o_ref[0] = jnp.maximum(y * scale_ref[...] + shift_ref[...], 0.0)


def plain_block_forward(x_nchw, conv_w_oihw, bn_gamma, bn_beta, *, stride=1, eps=1e-5):
    """Forward of PlainBlock. Input NCHW, conv weight OIHW (PyTorch conventions)."""
    N, Cin, H, W = x_nchw.shape
    Cout = conv_w_oihw.shape[0]
    Ho = (H + 2 - 3) // stride + 1
    Wo = (W + 2 - 3) // stride + 1

    # bf16 MXU inputs (halved DMA bytes); accumulation stays f32 in-kernel.
    x_bf = x_nchw.astype(jnp.bfloat16)
    # OIHW -> (O, KH, KW, I) -> (O, 9*I): rows ordered (kh, kw, cin) to match the kernel.
    w_mat = (
        jnp.transpose(conv_w_oihw, (0, 2, 3, 1))
        .reshape(Cout, 9 * Cin)
        .astype(jnp.bfloat16)
    )
    g2 = bn_gamma.reshape(Cout, 1).astype(jnp.float32)
    b2 = bn_beta.reshape(Cout, 1).astype(jnp.float32)

    kernel = functools.partial(
        _plain_block_kernel,
        stride=stride, eps=eps, H=H, W=W, Ho=Ho, Wo=Wo,
        count=float(N * Ho * Wo),
    )

    out = pl.pallas_call(
        kernel,
        out_shape=jax.ShapeDtypeStruct((N, Cout, Ho * Wo), jnp.float32),
        grid_spec=pltpu.PrefetchScalarGridSpec(
            num_scalar_prefetch=0,
            grid=(2, N),  # (phase, batch); phase 1 needs stats from all of phase 0.
            in_specs=[
                # x only needed in phase 0; keep its block index frozen in phase 1.
                pl.BlockSpec((1, Cin, H, W), lambda p, n: (n * (1 - p), 0, 0, 0)),
                pl.BlockSpec((Cout, 9 * Cin), lambda p, n: (0, 0)),
                pl.BlockSpec((Cout, 1), lambda p, n: (0, 0)),
                pl.BlockSpec((Cout, 1), lambda p, n: (0, 0)),
            ],
            # Output blocks only advance during phase 1 (no garbage write-backs in phase 0).
            out_specs=pl.BlockSpec((1, Cout, Ho * Wo), lambda p, n: (n * p, 0, 0)),
            scratch_shapes=[
                pltpu.VMEM((N, Cout, Ho * Wo), jnp.float32),  # conv result (on-chip)
                pltpu.VMEM((Cout, 1), jnp.float32),           # sum
                pltpu.VMEM((Cout, 1), jnp.float32),           # sum of squares
                pltpu.VMEM((Cout, 1), jnp.float32),           # scale
                pltpu.VMEM((Cout, 1), jnp.float32),           # shift
            ],
        ),
        compiler_params=pltpu.CompilerParams(
            # Sequential: phase 1 depends on stats accumulated across all of phase 0.
            dimension_semantics=("arbitrary", "arbitrary"),
        ),
    )(x_bf, w_mat, g2, b2)

    # (N, Cout, Ho*Wo) -> NCHW; pure metadata reshape, no transpose needed.
    return out.reshape(N, Cout, Ho, Wo)


def _reference(x_nchw, conv_w_oihw, bn_gamma, bn_beta, *, stride=1, eps=1e-5):
    # Mirror the kernel's bf16 input quantization (exact bf16 products, f32 accumulation),
    # so the comparison isolates kernel correctness rather than dtype choice.
    xq = x_nchw.astype(jnp.bfloat16).astype(jnp.float32)
    wq = conv_w_oihw.astype(jnp.bfloat16).astype(jnp.float32)
    y = lax.conv_general_dilated(
        xq, wq,
        window_strides=(stride, stride),
        padding=((1, 1), (1, 1)),
        dimension_numbers=("NCHW", "OIHW", "NCHW"),
        precision=lax.Precision.HIGHEST,
    )
    mean = jnp.mean(y, axis=(0, 2, 3), keepdims=True)
    var = jnp.mean((y - mean) ** 2, axis=(0, 2, 3), keepdims=True)
    yhat = (y - mean) * lax.rsqrt(var + eps)
    out = yhat * bn_gamma.reshape(1, -1, 1, 1) + bn_beta.reshape(1, -1, 1, 1)
    return jnp.maximum(out, 0.0)


if __name__ == "__main__":
    # Small shapes consistent with the module: PlainBlock(in_planes=4, planes=8, stride=1)
    N, in_planes, planes, H, W = 2, 4, 8, 16, 16
    stride = 1

    key = jax.random.PRNGKey(0)
    kx, kw, kg, kb = jax.random.split(key, 4)
    x = jax.random.normal(kx, (N, in_planes, H, W), dtype=jnp.float32)
    conv_w = jax.random.normal(kw, (planes, in_planes, 3, 3), dtype=jnp.float32) * 0.1
    bn_gamma = 1.0 + 0.1 * jax.random.normal(kg, (planes,), dtype=jnp.float32)
    bn_beta = 0.1 * jax.random.normal(kb, (planes,), dtype=jnp.float32)

    out = plain_block_forward(x, conv_w, bn_gamma, bn_beta, stride=stride)
    out = jax.block_until_ready(out)

    ref = _reference(x, conv_w, bn_gamma, bn_beta, stride=stride)
    np.testing.assert_allclose(np.asarray(out), np.asarray(ref), rtol=1e-3, atol=1e-3)

    print("KERNEL_OK")
</pallas_src>

<mosaic_0001>
module attributes {stable_mosaic.version = 11 : i64} {
  func.func @_plain_block_kernel(%arg0: i32, %arg1: i32, %arg2: memref<1x4x16x16xbf16, #tpu.memory_space<vmem>>, %arg3: memref<8x36xbf16, #tpu.memory_space<vmem>>, %arg4: memref<8x1xf32, #tpu.memory_space<vmem>>, %arg5: memref<8x1xf32, #tpu.memory_space<vmem>>, %arg6: memref<1x8x256xf32, #tpu.memory_space<vmem>>, %arg7: memref<2x8x256xf32, #tpu.memory_space<vmem>>, %arg8: memref<8x1xf32, #tpu.memory_space<vmem>>, %arg9: memref<8x1xf32, #tpu.memory_space<vmem>>, %arg10: memref<8x1xf32, #tpu.memory_space<vmem>>, %arg11: memref<8x1xf32, #tpu.memory_space<vmem>>) attributes {dimension_semantics = [#tpu.dimension_semantics<arbitrary>, #tpu.dimension_semantics<arbitrary>], iteration_bounds = array<i64: 2, 2>, scalar_prefetch = 0 : i64, scratch_operands = 5 : i64, tpu.core_type = #tpu.core_type<tc>, window_params = [{transform_indices = @transform_0, window_bounds = array<i64: 1, 4, 16, 16>}, {pipeline_mode = #tpu.pipeline_mode<synchronous>, transform_indices = @transform_1, window_bounds = array<i64: 8, 36>}, {pipeline_mode = #tpu.pipeline_mode<synchronous>, transform_indices = @transform_2, window_bounds = array<i64: 8, 1>}, {pipeline_mode = #tpu.pipeline_mode<synchronous>, transform_indices = @transform_3, window_bounds = array<i64: 8, 1>}, {transform_indices = @transform_4, window_bounds = array<i64: 1, 8, 256>}]} {
    %c0_i32 = arith.constant 0 : i32
    %0 = arith.cmpi eq, %arg0, %c0_i32 : i32
    %c0_i32_0 = arith.constant 0 : i32
    %1 = arith.cmpi eq, %arg1, %c0_i32_0 : i32
    %2 = arith.andi %0, %1 : i1
    %3 = arith.extui %2 : i1 to i32
    %c0_i32_1 = arith.constant 0 : i32
    %4 = arith.cmpi ne, %3, %c0_i32_1 : i32
    scf.if %4 {
      %cst = arith.constant 0.000000e+00 : f32
      %16 = vector.broadcast %cst : f32 to vector<8x1xf32>
      %c0 = arith.constant 0 : index
      %c0_8 = arith.constant 0 : index
      %17 = vector.load %arg8[%c0, %c0_8] : memref<8x1xf32, #tpu.memory_space<vmem>>, vector<8x1xf32>
      tpu.vector_store %arg8[%c0, %c0_8], %16 {strides = array<i32>} : memref<8x1xf32, #tpu.memory_space<vmem>>, vector<8x1xf32>,
      %cst_9 = arith.constant 0.000000e+00 : f32
      %18 = vector.broadcast %cst_9 : f32 to vector<8x1xf32>
      %c0_10 = arith.constant 0 : index
      %c0_11 = arith.constant 0 : index
      %19 = vector.load %arg9[%c0_10, %c0_11] : memref<8x1xf32, #tpu.memory_space<vmem>>, vector<8x1xf32>
      tpu.vector_store %arg9[%c0_10, %c0_11], %18 {strides = array<i32>} : memref<8x1xf32, #tpu.memory_space<vmem>>, vector<8x1xf32>,
    } else {
    }
    %c0_i32_2 = arith.constant 0 : i32
    %5 = arith.cmpi eq, %arg0, %c0_i32_2 : i32
    %6 = arith.extui %5 : i1 to i32
    %c0_i32_3 = arith.constant 0 : i32
    %7 = arith.cmpi ne, %6, %c0_i32_3 : i32
    scf.if %7 {
      %c0 = arith.constant 0 : index
      %c0_8 = arith.constant 0 : index
      %c0_9 = arith.constant 0 : index
      %c0_10 = arith.constant 0 : index
      %16 = vector.load %arg2[%c0, %c0_8, %c0_9, %c0_10] : memref<1x4x16x16xbf16, #tpu.memory_space<vmem>>, vector<1x4x16x16xbf16>
      %17 = vector.shape_cast %16 : vector<1x4x16x16xbf16> to vector<4x16x16xbf16>
      %cst = arith.constant 0.000000e+00 : bf16
      %18 = vector.broadcast %cst : bf16 to vector<4x16x1xbf16>
      %19 = tpu.concatenate %18, %17, %18 in 2 : vector<4x16x1xbf16>, vector<4x16x16xbf16>, vector<4x16x1xbf16> -> vector<4x16x18xbf16>
      %cst_11 = arith.constant 0.000000e+00 : bf16
      %20 = vector.broadcast %cst_11 : bf16 to vector<4x1x18xbf16>
      %21 = tpu.concatenate %20, %19, %20 in 1 : vector<4x1x18xbf16>, vector<4x16x18xbf16>, vector<4x1x18xbf16> -> vector<4x18x18xbf16>
      %22 = vector.extract_strided_slice %21 {offsets = [0, 0, 0], sizes = [4, 16, 16], strides = [1, 1, 1]} : vector<4x18x18xbf16> to vector<4x16x16xbf16>
      %23 = vector.shape_cast %22 : vector<4x16x16xbf16> to vector<4x256xbf16>
      %24 = vector.extract_strided_slice %21 {offsets = [0, 0, 1], sizes = [4, 16, 16], strides = [1, 1, 1]} : vector<4x18x18xbf16> to vector<4x16x16xbf16>
      %25 = vector.shape_cast %24 : vector<4x16x16xbf16> to vector<4x256xbf16>
      %26 = vector.extract_strided_slice %21 {offsets = [0, 0, 2], sizes = [4, 16, 16], strides = [1, 1, 1]} : vector<4x18x18xbf16> to vector<4x16x16xbf16>
      %27 = vector.shape_cast %26 : vector<4x16x16xbf16> to vector<4x256xbf16>
      %28 = vector.extract_strided_slice %21 {offsets = [0, 1, 0], sizes = [4, 16, 16], strides = [1, 1, 1]} : vector<4x18x18xbf16> to vector<4x16x16xbf16>
      %29 = vector.shape_cast %28 : vector<4x16x16xbf16> to vector<4x256xbf16>
      %30 = vector.extract_strided_slice %21 {offsets = [0, 1, 1], sizes = [4, 16, 16], strides = [1, 1, 1]} : vector<4x18x18xbf16> to vector<4x16x16xbf16>
      %31 = vector.shape_cast %30 : vector<4x16x16xbf16> to vector<4x256xbf16>
      %32 = vector.extract_strided_slice %21 {offsets = [0, 1, 2], sizes = [4, 16, 16], strides = [1, 1, 1]} : vector<4x18x18xbf16> to vector<4x16x16xbf16>
      %33 = vector.shape_cast %32 : vector<4x16x16xbf16> to vector<4x256xbf16>
      %34 = vector.extract_strided_slice %21 {offsets = [0, 2, 0], sizes = [4, 16, 16], strides = [1, 1, 1]} : vector<4x18x18xbf16> to vector<4x16x16xbf16>
      %35 = vector.shape_cast %34 : vector<4x16x16xbf16> to vector<4x256xbf16>
      %36 = vector.extract_strided_slice %21 {offsets = [0, 2, 1], sizes = [4, 16, 16], strides = [1, 1, 1]} : vector<4x18x18xbf16> to vector<4x16x16xbf16>
      %37 = vector.shape_cast %36 : vector<4x16x16xbf16> to vector<4x256xbf16>
      %38 = vector.extract_strided_slice %21 {offsets = [0, 2, 2], sizes = [4, 16, 16], strides = [1, 1, 1]} : vector<4x18x18xbf16> to vector<4x16x16xbf16>
      %39 = vector.shape_cast %38 : vector<4x16x16xbf16> to vector<4x256xbf16>
      %40 = tpu.concatenate %23, %25, %27, %29, %31, %33, %35, %37, %39 in 0 : vector<4x256xbf16>, vector<4x256xbf16>, vector<4x256xbf16>, vector<4x256xbf16>, vector<4x256xbf16>, vector<4x256xbf16>, vector<4x256xbf16>, vector<4x256xbf16>, vector<4x256xbf16> -> vector<36x256xbf16>
      %c0_12 = arith.constant 0 : index
      %c0_13 = arith.constant 0 : index
      %41 = vector.load %arg3[%c0_12, %c0_13] : memref<8x36xbf16, #tpu.memory_space<vmem>>, vector<8x36xbf16>
      %cst_14 = arith.constant dense<0.000000e+00> : vector<8x256xf32>
      %42 = tpu.matmul %41, %40, %cst_14 {dimension_numbers = #tpu.dot_dimension_numbers<[1], [0], [0], [1], [0, 0, 1, 1], [], []>} : vector<8x36xbf16>, vector<36x256xbf16>, vector<8x256xf32> -> vector<8x256xf32>
      %43 = arith.index_cast %arg1 : i32 to index
      %c0_15 = arith.constant 0 : index
      %c0_16 = arith.constant 0 : index
      %44 = vector.load %arg7[%43, %c0_15, %c0_16] : memref<2x8x256xf32, #tpu.memory_space<vmem>>, vector<1x8x256xf32>
      %45 = vector.shape_cast %44 : vector<1x8x256xf32> to vector<8x256xf32>
      %46 = vector.shape_cast %42 : vector<8x256xf32> to vector<1x8x256xf32>
      tpu.vector_store %arg7[%43, %c0_15, %c0_16], %46 {strides = array<i32>} : memref<2x8x256xf32, #tpu.memory_space<vmem>>, vector<1x8x256xf32>,
      %c0_17 = arith.constant 0 : index
      %c0_18 = arith.constant 0 : index
      %47 = vector.load %arg8[%c0_17, %c0_18] : memref<8x1xf32, #tpu.memory_space<vmem>>, vector<8x1xf32>
      %cst_19 = arith.constant dense<0.000000e+00> : vector<8xf32>
      %48 = vector.multi_reduction <add>, %42, %cst_19 [1] : vector<8x256xf32> to vector<8xf32>
      %49 = vector.shape_cast %48 : vector<8xf32> to vector<8x1xf32>
      %50 = arith.addf %47, %49 : vector<8x1xf32>
      %c0_20 = arith.constant 0 : index
      %c0_21 = arith.constant 0 : index
      %51 = vector.load %arg8[%c0_20, %c0_21] : memref<8x1xf32, #tpu.memory_space<vmem>>, vector<8x1xf32>
      tpu.vector_store %arg8[%c0_20, %c0_21], %50 {strides = array<i32>} : memref<8x1xf32, #tpu.memory_space<vmem>>, vector<8x1xf32>,
      %c0_22 = arith.constant 0 : index
      %c0_23 = arith.constant 0 : index
      %52 = vector.load %arg9[%c0_22, %c0_23] : memref<8x1xf32, #tpu.memory_space<vmem>>, vector<8x1xf32>
      %53 = arith.mulf %42, %42 : vector<8x256xf32>
      %cst_24 = arith.constant dense<0.000000e+00> : vector<8xf32>
      %54 = vector.multi_reduction <add>, %53, %cst_24 [1] : vector<8x256xf32> to vector<8xf32>
      %55 = vector.shape_cast %54 : vector<8xf32> to vector<8x1xf32>
      %56 = arith.addf %52, %55 : vector<8x1xf32>
      %c0_25 = arith.constant 0 : index
      %c0_26 = arith.constant 0 : index
      %57 = vector.load %arg9[%c0_25, %c0_26] : memref<8x1xf32, #tpu.memory_space<vmem>>, vector<8x1xf32>
      tpu.vector_store %arg9[%c0_25, %c0_26], %56 {strides = array<i32>} : memref<8x1xf32, #tpu.memory_space<vmem>>, vector<8x1xf32>,
    } else {
    }
    %c1_i32 = arith.constant 1 : i32
    %8 = arith.cmpi eq, %arg0, %c1_i32 : i32
    %c0_i32_4 = arith.constant 0 : i32
    %9 = arith.cmpi eq, %arg1, %c0_i32_4 : i32
    %10 = arith.andi %8, %9 : i1
    %11 = arith.extui %10 : i1 to i32
    %c0_i32_5 = arith.constant 0 : i32
    %12 = arith.cmpi ne, %11, %c0_i32_5 : i32
    scf.if %12 {
      %c0 = arith.constant 0 : index
      %c0_8 = arith.constant 0 : index
      %16 = vector.load %arg8[%c0, %c0_8] : memref<8x1xf32, #tpu.memory_space<vmem>>, vector<8x1xf32>
      %cst = arith.constant 5.120000e+02 : f32
      %17 = vector.broadcast %cst : f32 to vector<8x1xf32>
      %18 = arith.divf %16, %17 : vector<8x1xf32>
      %c0_9 = arith.constant 0 : index
      %c0_10 = arith.constant 0 : index
      %19 = vector.load %arg9[%c0_9, %c0_10] : memref<8x1xf32, #tpu.memory_space<vmem>>, vector<8x1xf32>
      %cst_11 = arith.constant 5.120000e+02 : f32
      %20 = vector.broadcast %cst_11 : f32 to vector<8x1xf32>
      %21 = arith.divf %19, %20 : vector<8x1xf32>
      %22 = arith.mulf %18, %18 : vector<8x1xf32>
      %23 = arith.subf %21, %22 : vector<8x1xf32>
      %cst_12 = arith.constant 9.99999974E-6 : f32
      %24 = vector.broadcast %cst_12 : f32 to vector<8x1xf32>
      %25 = arith.addf %23, %24 : vector<8x1xf32>
      %26 = math.rsqrt %25 : vector<8x1xf32>
      %c0_13 = arith.constant 0 : index
      %c0_14 = arith.constant 0 : index
      %27 = vector.load %arg4[%c0_13, %c0_14] : memref<8x1xf32, #tpu.memory_space<vmem>>, vector<8x1xf32>
      %28 = arith.mulf %27, %26 : vector<8x1xf32>
      %c0_15 = arith.constant 0 : index
      %c0_16 = arith.constant 0 : index
      %29 = vector.load %arg10[%c0_15, %c0_16] : memref<8x1xf32, #tpu.memory_space<vmem>>, vector<8x1xf32>
      tpu.vector_store %arg10[%c0_15, %c0_16], %28 {strides = array<i32>} : memref<8x1xf32, #tpu.memory_space<vmem>>, vector<8x1xf32>,
      %c0_17 = arith.constant 0 : index
      %c0_18 = arith.constant 0 : index
      %30 = vector.load %arg5[%c0_17, %c0_18] : memref<8x1xf32, #tpu.memory_space<vmem>>, vector<8x1xf32>
      %c0_19 = arith.constant 0 : index
      %c0_20 = arith.constant 0 : index
      %31 = vector.load %arg4[%c0_19, %c0_20] : memref<8x1xf32, #tpu.memory_space<vmem>>, vector<8x1xf32>
      %32 = arith.mulf %18, %31 : vector<8x1xf32>
      %33 = arith.mulf %32, %26 : vector<8x1xf32>
      %34 = arith.subf %30, %33 : vector<8x1xf32>
      %c0_21 = arith.constant 0 : index
      %c0_22 = arith.constant 0 : index
      %35 = vector.load %arg11[%c0_21, %c0_22] : memref<8x1xf32, #tpu.memory_space<vmem>>, vector<8x1xf32>
      tpu.vector_store %arg11[%c0_21, %c0_22], %34 {strides = array<i32>} : memref<8x1xf32, #tpu.memory_space<vmem>>, vector<8x1xf32>,
    } else {
    }
    %c1_i32_6 = arith.constant 1 : i32
    %13 = arith.cmpi eq, %arg0, %c1_i32_6 : i32
    %14 = arith.extui %13 : i1 to i32
    %c0_i32_7 = arith.constant 0 : i32
    %15 = arith.cmpi ne, %14, %c0_i32_7 : i32
    scf.if %15 {
      %16 = arith.index_cast %arg1 : i32 to index
      %c0 = arith.constant 0 : index
      %c0_8 = arith.constant 0 : index
      %17 = vector.load %arg7[%16, %c0, %c0_8] : memref<2x8x256xf32, #tpu.memory_space<vmem>>, vector<1x8x256xf32>
      %18 = vector.shape_cast %17 : vector<1x8x256xf32> to vector<8x256xf32>
      %c0_9 = arith.constant 0 : index
      %c0_10 = arith.constant 0 : index
      %19 = vector.load %arg10[%c0_9, %c0_10] : memref<8x1xf32, #tpu.memory_space<vmem>>, vector<8x1xf32>
      %20 = vector.broadcast %19 : vector<8x1xf32> to vector<8x256xf32>
      %21 = arith.mulf %18, %20 : vector<8x256xf32>
      %c0_11 = arith.constant 0 : index
      %c0_12 = arith.constant 0 : index
      %22 = vector.load %arg11[%c0_11, %c0_12] : memref<8x1xf32, #tpu.memory_space<vmem>>, vector<8x1xf32>
      %23 = vector.broadcast %22 : vector<8x1xf32> to vector<8x256xf32>
      %24 = arith.addf %21, %23 : vector<8x256xf32>
      %cst = arith.constant 0.000000e+00 : f32
      %25 = vector.broadcast %cst : f32 to vector<8x256xf32>
      %26 = arith.maximumf %24, %25 : vector<8x256xf32>
      %c0_13 = arith.constant 0 : index
      %c0_14 = arith.constant 0 : index
      %c0_15 = arith.constant 0 : index
      %27 = vector.load %arg6[%c0_13, %c0_14, %c0_15] : memref<1x8x256xf32, #tpu.memory_space<vmem>>, vector<1x8x256xf32>
      %28 = vector.shape_cast %27 : vector<1x8x256xf32> to vector<8x256xf32>
      %29 = vector.shape_cast %26 : vector<8x256xf32> to vector<1x8x256xf32>
      tpu.vector_store %arg6[%c0_13, %c0_14, %c0_15], %29 {strides = array<i32>} : memref<1x8x256xf32, #tpu.memory_space<vmem>>, vector<1x8x256xf32>,
    } else {
    }
    return
  }
  func.func @transform_0(%arg0: i32, %arg1: i32) -> (i32, i32, i32, i32) {
    %c1_i32 = arith.constant 1 : i32
    %0 = arith.subi %c1_i32, %arg0 : i32
    %1 = arith.muli %arg1, %0 : i32
    %c0_i32 = arith.constant 0 : i32
    %c0_i32_0 = arith.constant 0 : i32
    %c0_i32_1 = arith.constant 0 : i32
    %c0_i32_2 = arith.constant 0 : i32
    return %1, %c0_i32, %c0_i32_0, %c0_i32_1 : i32, i32, i32, i32
  }
  func.func @transform_1(%arg0: i32, %arg1: i32) -> (i32, i32) {
    %c0_i32 = arith.constant 0 : i32
    %c0_i32_0 = arith.constant 0 : i32
    %c0_i32_1 = arith.constant 0 : i32
    return %c0_i32, %c0_i32_0 : i32, i32
  }
  func.func @transform_2(%arg0: i32, %arg1: i32) -> (i32, i32) {
    %c0_i32 = arith.constant 0 : i32
    %c0_i32_0 = arith.constant 0 : i32
    %c0_i32_1 = arith.constant 0 : i32
    return %c0_i32, %c0_i32_0 : i32, i32
  }
  func.func @transform_3(%arg0: i32, %arg1: i32) -> (i32, i32) {
    %c0_i32 = arith.constant 0 : i32
    %c0_i32_0 = arith.constant 0 : i32
    %c0_i32_1 = arith.constant 0 : i32
    return %c0_i32, %c0_i32_0 : i32, i32
  }
  func.func @transform_4(%arg0: i32, %arg1: i32) -> (i32, i32, i32) {
    %0 = arith.muli %arg1, %arg0 : i32
    %c0_i32 = arith.constant 0 : i32
    %c0_i32_0 = arith.constant 0 : i32
    %c0_i32_1 = arith.constant 0 : i32
    return %0, %c0_i32, %c0_i32_0 : i32, i32, i32
  }
}

</mosaic_0001>

<bundles_post_ra>
// kernel: tpu_custom_call.1
= control target key start
LH: loop header
LB: loop body
LE: loop exit
PB: predicated region body
PF: predicated region fallthrough
CT: control target
= control target key end

     0   :  { %9 = vsyncpa [#allocation8], 0  ;;  %s4582_s0 = inlined_call_operand.hbm [shape: bf16[2,4,16,16], index: 0, kind: input, shape index: {}]   ;;  %s4583_s1 = inlined_call_operand.vmem [shape: bf16[8,36], index: 1, kind: input, shape index: {}]   ;;  %s4584_s2 = inlined_call_operand.vmem [shape: f32[8,1], index: 2, kind: input, shape index: {}]   ;;  %s4585_s3 = inlined_call_operand.vmem [shape: f32[8,1], index: 3, kind: input, shape index: {}]   ;;  %s4586_s4 = inlined_call_operand.hbm [shape: f32[2,8,256], index: 4, kind: output, shape index: {}]  }
   0x1   :  { %11 = vsyncpa [#allocation8 + $0x1], 0 }
   0x2   :  { %12 = vsyncpa [#allocation9], 0 }
   0x3   :  { %14 = vsyncpa [#allocation9 + $0x1], 0  ;;  %s2847_s15 = smov 0   ;;  %s2849_s16 = smov 0  }
   0x4   :  { %s2851_s17 = smov 0   ;;  %s2853_s18 = smov 0  }
   0x5   :  { %s2855_s19 = smov 0   ;;  %s2857_s20 = smov 0  }
   0x6   :  { %s2859_s21 = smov 0   ;;  %s2861_s22 = smov 0  }
   0x7   :  { %s2863_s23 = smov 0   ;;  %s2865_s24 = smov 0  }
   0x8   :  { %s2867_s25 = smov 0  }
   0x9 LB: > { %4602 = sst [smem:[#allocation13_spill]] %s2794_s23  ;;  %s2478_s26 = sadd.s32 4294967295, %s2802_s25   ;;  %s2802_s25 = sphi %s2867_s25, %s20_s25   ;;  %s2798_s24 = sphi %s2865_s24, %s4671_s24   ;;  %s2794_s23 = sphi %s2863_s23, %s4663_s23   ;;  %s2790_s22 = sphi %s2861_s22, %s4662_s22   ;;  %s2786_s21 = sphi %s2859_s21, %s4661_s21   ;;  %s2782_s20 = sphi %s2857_s20, %s4670_s20   ;;  %s2778_s19 = sphi %s2855_s19, %s4669_s19   ;;  %s2774_s18 = sphi %s2853_s18, %s4668_s18   ;;  %s2770_s17 = sphi %s2851_s17, %s4667_s17   ;;  %s2766_s16 = sphi %s2849_s16, %s4666_s16   ;;  %s2762_s15 = sphi %s2847_s15, %s4665_s15  }
   0xa   : > { %4603 = sst [smem:[#allocation14_spill]] %s2798_s24  ;;  %s29_s28 = sadd.s32 1, %s2794_s23 }
   0xb   : > { %s32_s29 = sadd.s32 1, %s2798_s24  ;;  %p30_p0 = scmp.ge.s32.totalorder %s29_s28, 2 }
   0xc   : > { %s36_s30 = ssub.s32 1, %s2798_s24  ;;  %s43_s6 = sadd.s32 1, %s2782_s20 }
   0xd   : > { %s2906_s5 = smul.u32 %s2794_s23, %s36_s30  ;;  %s4673_s28 = smov (%p30_p0, %s29_s28), 0 }
   0xe   : > { %4604 = sst [smem:[#allocation15_spill]] %s4673_s28  ;;  %s4675_s29 = smov (!%p30_p0, %s32_s29), %s2798_s24 }
   0xf   : > { %p50_p1 = scmp.ne.s32.totalorder %s2782_s20, %s2778_s19  ;;  %p51_p2 = scmp.eq.s32.totalorder %s2802_s25, 0 }
  0x10   : > { %p34_p3 = scmp.ge.s32.totalorder %s4675_s29, 2  ;;  %p56_p4 = scmp.ne.s32.totalorder %s2778_s19, %s2774_s18 }
  0x11   : > { %p2916_p5 = por %p51_p2, %p50_p1  ;;  %p57_p6 = scmp.eq.s32.totalorder %s2478_s26, 0 }
  0x12   : > { %s4677_s29 = smov (%p34_p3, %s4675_s29), 0  ;;  %s129_s9 = smul.u32 %s2794_s23, %s2798_s24 }
  0x13   : > { %4606 = sst [smem:[#allocation16_spill]] %s4677_s29  ;;  %p2922_p7 = por %p57_p6, %p56_p4 }
  0x14   : > { %s38_s10 = ssub.s32 1, %s4677_s29  ;;  %s130_s11 = smul.u32 %s4677_s29, %s4673_s28 }
  0x15   : > { %s39_s12 = smul.u32 %s38_s10, %s4673_s28  ;;  %s134_s13 = sadd.s32 1, %s2770_s17 }
  0x16   : > { %s131_s14 = ssub.s32 %s129_s9, %s130_s11  ;;  %p144_p8 = scmp.ne.s32.totalorder %s2770_s17, %s2766_s16 }
  0x17   : > { %s40_s18 = ssub.s32 %s2906_s5, %s39_s12  ;;  %p132_p9 = scmp.eq.s32.totalorder %s131_s14, 0 }
  0x18   : > { %p41_p10 = scmp.eq.s32.totalorder %s40_s18, 0  ;;  %p145_p11 = scmp.eq.s32.totalorder %s2478_s26, 3 }
  0x19   : > { %s2937_s30 = scalar_select %p132_p9, %s2770_s17, %s134_s13  }
  0x1a   : > { %s2940_s27 = scalar_select %p41_p10, %s2782_s20, %s43_s6  }
  0x1b   : > { %p2942_p12 = por %p145_p11, %p144_p8  ;;  %p150_p13 = scmp.ne.s32.totalorder %s2766_s16, %s2762_s15 }
  0x1c   : > { %4608 = sst [smem:[#allocation17_spill]] %s2940_s27  ;;  %s4610_s10 = sadd.s32 4294967294, %s2802_s25  }
  0x1d   : > { %p151_p0 = scmp.eq.s32.totalorder %s4610_s10, 3  ;;  %p2537_p1 = scmp.lt.s32.totalorder %s2802_s25, 4 }
  0x1e   : > { %s180_s9 = sand.u32 1, %s2782_s20   ;;  %s2517_s12 = sshll.u32 %s2906_s5, 5 }
  0x1f   : > { %p2952_p2 = por %p151_p0, %p150_p13  ;;  %s2482_s26 = sshll.u32 %s180_s9, 5 }
  0x20   : > { %s191_s14 = scalar_lea.hbm %s4582_s0, %s2517_s12  ;;  %s184_s29 = scalar_lea.vmem [#allocation7], %s2482_s26 }
  0x21   : > { %s192_s18 = sshll.u32 %s191_s14, 4  ;;  %s194_s28 = sshll.u32 %s184_s29, 4  ;;  %s193_s18 = int_to_ptr.hbm [resolvable:$true] %s192_s18  ;;  %s195_s28 = int_to_ptr.vmem [resolvable:$true] %s194_s28 }
  0x22   : > { %p2530_p3 = pnand %p2537_p1, %p2916_p5  ;;  %p2485_p4 = scmp.ge.s32.totalorder %s2802_s25, 1 }
  0x23   : > { %p202_p6 = scmp.lt.s32.totalorder %s2802_s25, 5  ;;  %s181_s10 = scalar_lea.sflag [#allocation8], %s180_s9 }
  0x24   : > { %s2804_s23 = smov 64   ;;  %s2805_s27 = smov 4  }
  0x25   : > { %2532 = dma.hbm_to_vmem [thread:$0]  (!%p2530_p3), %s193_s18, 512, %s195_s28, %s181_s10, %s2804_s23, %s2804_s23, %s2805_s27  }
  0x26   : > { %p203_p8 = pnand %p2485_p4, %p202_p6 }
  0x27   : > { %s208_s5 = sand.u32 (!%p203_p8), 1, %s2778_s19  }
  0x28   : > { %206 = sbr.rel (%p203_p8) target bundleno = 1171 (0x493), region = 36  ;;  %s2486_s13 = sshll.u32 (!%p203_p8), %s208_s5, 5 }
  0x29   : > { %s209_s12 = scalar_lea.sflag (!%p203_p8), [#allocation8], %s208_s5  ;;  %s212_s6 = scalar_lea.vmem (!%p203_p8), [#allocation7], %s2486_s13 }
  0x2d   : > { %2753 = dma.done.wait (%p2922_p7), %s209_s12, 512  }
  0x2e   : > { %2755 = vsyncadd (%p2922_p7), %s209_s12, 4294966784  ;;  %s235_s29 = sand.u32 1, %s2766_s16   ;;  %p242_p5 = scmp.eq.s32.totalorder %s2790_s22, 0 }
  0x2f   : > { %s2487_s23 = sshll.u32 %s235_s29, 4  ;;  %p243_p9 = scmp.eq.s32.totalorder %s2786_s21, 0 }
  0x30   : > { %s2976_s27 = scalar_lea.vmem [#allocation10], %s2487_s23 }
  0x31   : > { %p244_p10 = pnand %p243_p9, %p242_p5 }
  0x33   : > { %247 = sbr.rel (%p244_p10) target bundleno = 59 (0x3b), region = 44 }
  0x38   : > { %vm248_vm0 = vcmask 7168   ;;  %v2806_v0 = vmov 0.0  }
  0x39   : > { %249 = vst.msk [vmem:[#allocation3] sm:$0xff] %vm248_vm0, %v2806_v0 }
  0x3a   : > { %250 = vst.msk [vmem:[#allocation4] sm:$0xff] %vm248_vm0, %v2806_v0 }
  0x3b PF: > { %p2488_p7 = scmp.ne.s32.totalorder %s2790_s22, 0 }
  0x3d   : > { %253 = sbr.rel (%p2488_p7) target bundleno = 959 (0x3bf), region = 48 }
  0x42   : > { %v2520_v1 = vld [vmem:[%s212_s6 + $0x10] sm:$0xff]  ;;  %v2518_v2 = vld [vmem:[%s212_s6] sm:$0xff]  ;;  %s2807_s28 = smov 1   ;;  %v2521_v3 = vld [vmem:[%s212_s6 + $0x18] sm:$0xff]  ;;  %vm290_vm1 = vcmask 7168   ;;  %vm300_vm2 = vcmask 138240  }
  0x43   : > { %286 = vrot.lane.b32.xlu1 %v2520_v1, %s2807_s28  ;;  %282 = vrot.lane.b32.xlu0 %v2518_v2, %s2807_s28  ;;  %v2519_v4 = vld [vmem:[%s212_s6 + $0x8] sm:$0xff]  ;;  %vm337_vm3 = vcmask 1040384   ;;  %vm338_vm4 = vsmask.f32 256  ;;  %s2808_s7 = smov 127   ;;  %vm1594_vm6 = vcmask 1046528  }
  0x44   : > { %vm2983_vm5 = vmand %vm337_vm3, %vm338_vm4  ;;  %s2809_s8 = smov 126   ;;  %vm957_vm7 = vsmask.f32 7424  ;;  %vm370_vm8 = vcmask 1047556   ;;  %s2813_s9 = smov 16   ;;  %vm516_vm9 = vcmask 130048  }
  0x45   : > { %s2814_s26 = smov 64   ;;  %s2815_s14 = smov 80   ;;  %vm520_vm10 = vcmask 261120   ;;  %vm523_vm11 = vcmask 392192   ;;  %vm526_vm12 = vcmask 523264   ;;  %vm529_vm13 = vcmask 654336  }
  0x46   : > { %s2816_s18 = smov 96   ;;  %s2817_s10 = smov 112   ;;  %vm532_vm14 = vcmask 785408   ;;  %vm535_vm15 = vcmask 916480   ;;  %vm2223_vm0 = vcmask 1041408   ;;  %vm2233_vm3 = vcmask 1045504  }
  0x47   : > { %s2818_s5 = smov 48   ;;  %s2819_s13 = smov 32   ;;  %vm2255_vm4 = vcmask 293888  }
  0x48   : > { %s2522_s23 = sshll.u32 %s2786_s21, 4 }
  0x4b   : > { %288 = vrot.lane.b32.xlu1 %v2521_v3, %s2807_s28  ;;  %284 = vrot.lane.b32.xlu0 %v2519_v4, %s2807_s28  ;;  %s2291_s28 = scalar_lea.vmem [#allocation2], %s2522_s23 }
  0xb5   : > { %v287_v5 = vpop.permute.xlu1 %286  ;;  %v283_v6 = vpop.permute.xlu0 %282 }
  0xb6   : > { %v297_v7 = vsel %vm290_vm1, 0, %v287_v5  ;;  %v293_v8 = vsel %vm290_vm1, 0, %v283_v6  ;;  %v2810_v5 = vmov 1983009808  }
  0xb7   : > { %v303_v9 = vsel %vm300_vm2, %v297_v7, 0  ;;  %v301_v10 = vsel %vm300_vm2, %v293_v8, 0  ;;  %v373_v6 = vunpack.c.l.s4 %v2810_v5 }
  0xb8   : > { %v317_v11 = vshrl.u32 %v303_v9, 16  ;;  %v320_v12 = vshll.u32 %v303_v9, 16  ;;  %v305_v13 = vshrl.u32 %v301_v10, 16  ;;  %v308_v16 = vshll.u32 %v301_v10, 16 }
  0xba   : > { %v319_v14 = vrot.slane %v317_v11, 7  ;;  %v307_v15 = vrot.slane %v305_v13, 7  ;;  %v3069_v13 = vunpack.c.0.s8 %v373_v6 }
  0xbc   : > { %v322_v18 = vor.u32 %v320_v12, %v319_v14  ;;  %v310_v19 = vor.u32 %v308_v16, %v307_v15  ;;  %v2989_v20 = vsel %vm2983_vm5, %v319_v14, 0  ;;  %v3009_v29 = vsel %vm2983_vm5, %v307_v15, 0 }
  0xbd   : > { %v289_v21 = vpop.permute.xlu1 %288  ;;  %v285_v22 = vpop.permute.xlu0 %284  ;;  %v1602_v33 = vrot.slane %v2989_v20, 1  ;;  %v1596_v39 = vrot.slane %v3009_v29, 1  ;;  %v984_v0 = vshll.u32 %v2989_v20, 16 }
  0xbe   : > { %v2993_v23 = vsel %vm2983_vm5, 0, %v322_v18  ;;  %v2997_v24 = vsel %vm2983_vm5, 0, %v310_v19  ;;  %v299_v25 = vsel %vm290_vm1, 0, %v289_v21  ;;  %v295_v26 = vsel %vm290_vm1, 0, %v285_v22 }
  0xbf   : > { %v304_v27 = vsel %vm300_vm2, %v299_v25, 0  ;;  %v302_v28 = vsel %vm300_vm2, %v295_v26, 0  ;;  %561 = vrot.lane.b32.xlu2 %v2993_v23, %s2808_s7  ;;  %557 = vrot.lane.b32.xlu0 %v2997_v24, %s2808_s7  ;;  %v1601_v37 = vrot.slane %v2993_v23, 1  ;;  %v1595_v38 = vrot.slane %v2997_v24, 1 }
  0xc0   : > { %v323_v30 = vshrl.u32 %v304_v27, 16  ;;  %v326_v31 = vshll.u32 %v304_v27, 16  ;;  %v311_v32 = vshrl.u32 %v302_v28, 16  ;;  %v314_v34 = vshll.u32 %v302_v28, 16 }
  0xc1   : > { %v1603_v47 = vsel %vm1594_vm6, %v1601_v37, %v1602_v33  ;;  %v3031_v48 = vsel %vm1594_vm6, %v1595_v38, %v1596_v39  ;;  %v979_v63 = vshll.u32 %v2993_v23, 16  ;;  %v360_v3 = vshrl.u32 %v2993_v23, 16 }
  0xc2   : > { %v325_v35 = vrot.slane %v323_v30, 7  ;;  %v313_v36 = vrot.slane %v311_v32, 7  ;;  %v1619_v53 = vshrl.u32 %v1603_v47, 16  ;;  %v1611_v54 = vshrl.u32 %v3031_v48, 16 }
  0xc3   : > { %v981_v4 = vrot.slane %v979_v63, 1  ;;  %v986_v8 = vrot.slane %v984_v0, 1  ;;  %v959_v12 = vshll.u32 %v2997_v24, 16  ;;  %v964_v18 = vshll.u32 %v3009_v29, 16 }
  0xc4   : > { %v328_v40 = vor.u32 %v326_v31, %v325_v35  ;;  %v347_v41 = vsel %vm2983_vm5, %v325_v35, 0  ;;  %v316_v42 = vor.u32 %v314_v34, %v313_v36  ;;  %v3019_v43 = vsel %vm2983_vm5, %v313_v36, 0 }
  0xc5   : > { %v1605_v44 = vrot.slane %v347_v41, 1  ;;  %v1599_v49 = vrot.slane %v3019_v43, 1  ;;  %v994_v1 = vshll.u32 %v347_v41, 16  ;;  %v982_v11 = vor.u32 %v981_v4, %v360_v3 }
  0xc6   : > { %v3023_v45 = vsel %vm2983_vm5, 0, %v328_v40  ;;  %v3027_v46 = vsel %vm2983_vm5, 0, %v316_v42  ;;  %v961_v17 = vrot.slane %v959_v12, 1  ;;  %v2811_v19 = vmov 0  }
  0xc7   : > { %761 = vrot.lane.b32.xlu2 %v2993_v23, %s2809_s8  ;;  %563 = vrot.lane.b32.xlu0 %v3023_v45, %s2808_s7  ;;  %v1604_v50 = vrot.slane %v3023_v45, 1  ;;  %v1598_v51 = vrot.slane %v3027_v46, 1  ;;  %v989_v62 = vshll.u32 %v3023_v45, 16  ;;  %v361_v7 = vshrl.u32 %v3023_v45, 16 }
  0xc8   : > { %559 = vrot.lane.b32.xlu1 %v3027_v46, %s2808_s7  ;;  %v996_v9 = vrot.slane %v994_v1, 1  ;;  %v3076_v16 = vsel %vm957_vm7, %v982_v11, %v986_v8  ;;  %v3083_v20 = vpack.i.b16 0, %v2811_v19  ;;  %v352_v21 = vshrl.u32 %v2997_v24, 16 }
  0xc9   : > { %v1606_v52 = vsel %vm1594_vm6, %v1604_v50, %v1605_v44  ;;  %v1600_v55 = vsel %vm1594_vm6, %v1598_v51, %v1599_v49  ;;  %v991_v2 = vrot.slane %v989_v62, 1  ;;  %v969_v26 = vshll.u32 %v3027_v46, 16 }
  0xca   : > { %v1620_v56 = vshrl.u32 %v1606_v52, 16  ;;  %v1617_v57 = vpack.i.b16 %v1606_v52, %v1603_v47  ;;  %v1609_v58 = vpack.i.b16 %v1600_v55, %v3031_v48  ;;  %v1612_v59 = vshrl.u32 %v1600_v55, 16 }
  0xcb   : > { %v992_v10 = vor.u32 %v991_v2, %v361_v7  ;;  %v962_v28 = vor.u32 %v961_v17, %v352_v21  ;;  %v966_v31 = vrot.slane %v964_v18, 1  ;;  %v974_v32 = vshll.u32 %v3019_v43, 16 }
  0xcc   : > { %v3046_v60 = vpack.i.b16 %v1620_v56, %v1619_v53  ;;  %v3048_v61 = vpack.i.b16 %v1612_v59, %v1611_v54  ;;  %v1638_v14 = vperm.slane %v1617_v57, %v3069_v13  ;;  %v1633_v22 = vrot.slane %v1617_v57, 4 }
  0xcd   : > { %v3073_v15 = vsel %vm957_vm7, %v992_v10, %v996_v9  ;;  %v1623_v25 = vrot.slane %v1609_v58, 4  ;;  %v1628_v27 = vperm.slane %v1609_v58, %v3069_v13  ;;  %v353_v33 = vshrl.u32 %v3027_v46, 16 }
  0xce   : > { %v1690_v29 = vperm.slane %v3046_v60, %v3069_v13  ;;  %v1643_v30 = vrot.slane %v1638_v14, 4  ;;  %v1675_v34 = vrot.slane %v3048_v61, 4  ;;  %v1680_v35 = vperm.slane %v3048_v61, %v3069_v13 }
  0xcf   : > { %2005 = vrot.lane.b32.xlu2 %v1606_v52, %s2809_s8  ;;  %757 = vrot.lane.b32.xlu0 %v2997_v24, %s2809_s8  ;;  %v1634_v38 = vsel %vm370_vm8, %v3083_v20, %v1633_v22  ;;  %v1685_v39 = vrot.slane %v3046_v60, 4  ;;  %v3102_v40 = vpack.i.b16 %v361_v7, %v360_v3  ;;  %v1624_v41 = vsel %vm370_vm8, %v3083_v20, %v1623_v25 }
  0xd0   : > { %759 = vrot.lane.b32.xlu1 %v3027_v46, %s2809_s8  ;;  %v1695_v36 = vrot.slane %v1690_v29, 4  ;;  %v3097_v37 = vsel %vm370_vm8, %v1643_v30, %v1628_v27  ;;  %v3107_v42 = vsel %vm957_vm7, %v962_v28, %v966_v31  ;;  %v971_v43 = vrot.slane %v969_v26, 1 }
  0xd1   : > { %v1632_v49 = vperm.slane %v1624_v41, %v3069_v13  ;;  %v3121_v50 = vpack.i.b16 %v353_v33, %v352_v21  ;;  %v2812_v51 = vmov 1934713408   ;;  %v1642_v53 = vperm.slane %v1634_v38, %v3069_v13 }
  0xd2   : > { %v3110_v44 = vsel %vm370_vm8, %v1695_v36, %v1680_v35  ;;  %v1676_v54 = vsel %vm370_vm8, %v3083_v20, %v1675_v34  ;;  %v437_v56 = vperm.slane %v3102_v40, %v3069_v13  ;;  %v972_v57 = vor.u32 %v971_v43, %v353_v33 }
  0xd3   : > { %v1645_v59 = vrot.slane %v1628_v27, 4  ;;  %v1657_v61 = vrot.slane %v1632_v49, 4  ;;  %v1697_v62 = vrot.slane %v1680_v35, 4  ;;  %v427_v0 = vperm.slane %v3121_v50, %v3069_v13 }
  0xd4   : > { %v358_v4 = vpack.i.b16 %v3023_v45, %v2993_v23  ;;  %v442_v9 = vrot.slane %v437_v56, 4  ;;  %v432_v26 = vrot.slane %v3102_v40, 4  ;;  %v422_v36 = vrot.slane %v3121_v50, 4 }
  0xd5   : > { %v3139_v3 = vsel %vm370_vm8, %v1638_v14, %v1645_v59  ;;  %v3144_v6 = vsel %vm370_vm8, %v1642_v53, %v1657_v61  ;;  %v3147_v7 = vsel %vm370_vm8, %v1690_v29, %v1697_v62  ;;  %vm2228_vm2 = vcmask 1043456  }
  0xd6   : > { %4614 = vst [vmem:[#allocation18_spill] sm:$0xff] %v3139_v3  ;;  %v385_v12 = vperm.slane %v358_v4, %v3069_v13  ;;  %v443_v18 = vsel %vm370_vm8, %v442_v9, %v427_v0  ;;  %v380_v19 = vrot.slane %v358_v4, 4  ;;  %v433_v33 = vsel %vm370_vm8, %v3083_v20, %v432_v26 }
  0xd7   : > { %1805 = vrot.lane.b32.xlu2 %v1606_v52, %s2808_s7  ;;  %763 = vrot.lane.b32.xlu0 %v3023_v45, %s2809_s8  ;;  %v395_v52 = vunpack.c.l.s4 %v2812_v51  ;;  %4615 = vst [vmem:[#allocation19_spill] sm:$0xff] %v3144_v6  ;;  %v444_v45 = vrot.slane %v427_v0, 4  ;;  %v441_v41 = vperm.slane %v433_v33, %v3069_v13  ;;  %v423_v51 = vsel %vm370_vm8, %v3083_v20, %v422_v36 }
  0xd8   : > { %2003 = vrot.lane.b32.xlu1 %v1603_v47, %s2809_s8  ;;  %4616 = vst [vmem:[#allocation20_spill] sm:$0xff] %v3147_v7  ;;  %v390_v30 = vrot.slane %v385_v12, 4  ;;  %v381_v31 = vsel %vm370_vm8, %v3083_v20, %v380_v19  ;;  %v1008_v0 = vpack.i.b16 %v3073_v15, %v3076_v16 }
  0xd9   : > { %v3167_v17 = vunpack.c.0.s8 %v395_v52  ;;  %v445_v22 = vsel %vm370_vm8, %v437_v56, %v444_v45  ;;  %v389_v35 = vperm.slane %v381_v31, %v3069_v13  ;;  %v454_v52 = vrot.slane %v441_v41, 4 }
  0xda   : > { %v1024_v36 = vrot.slane %v1008_v0, 4 }
  0xdb   : > { %v449_v27 = vperm.slane %v443_v18, %v3167_v17  ;;  %v453_v29 = vperm.slane %v445_v22, %v3167_v17 }
  0xdd   : > { %v468_v38 = vrot.slane %v453_v29, 4 }
  0xdf   : > { %1999 = vrot.lane.b32.xlu0 %v3031_v48, %s2809_s8  ;;  %1801 = vrot.lane.b32.xlu2 %v1600_v55, %s2808_s7 }
  0xe0   : > { %1803 = vrot.lane.b32.xlu1 %v1603_v47, %s2808_s7  ;;  %v350_v47 = vpack.i.b16 %v3027_v46, %v2997_v24  ;;  %v1684_v24 = vperm.slane %v1676_v54, %v3069_v13  ;;  %v1686_v46 = vsel %vm370_vm8, %v3083_v20, %v1685_v39 }
  0xe1   : > { %v1694_v58 = vperm.slane %v1686_v46, %v3069_v13 }
  0xe2   : > { %v375_v60 = vperm.slane %v350_v47, %v3069_v13  ;;  %v1709_v63 = vrot.slane %v1684_v24, 4  ;;  %v369_v5 = vrot.slane %v350_v47, 4 }
  0xe3   : > { %v1707_v2 = vrot.slane %v1694_v58, 4 }
  0xe4   : > { %v3156_v11 = vsel %vm370_vm8, %v1694_v58, %v1709_v63  ;;  %v392_v23 = vrot.slane %v375_v60, 4  ;;  %v371_v14 = vsel %vm370_vm8, %v3083_v20, %v369_v5  ;;  %v391_v39 = vsel %vm370_vm8, %v390_v30, %v375_v60 }
  0xe5   : > { %v3153_v10 = vsel %vm370_vm8, %v1707_v2, %v1684_v24  ;;  %4617 = vst [vmem:[#allocation21_spill] sm:$0xff] %v3156_v11  ;;  %v379_v25 = vperm.slane %v371_v14, %v3069_v13  ;;  %v3192_v47 = vperm.slane %v391_v39, %v3167_v17  ;;  %v402_v63 = vrot.slane %v389_v35, 4 }
  0xe6   : > { %v393_v21 = vsel %vm370_vm8, %v385_v12, %v392_v23  ;;  %v1011_v2 = vshrl.u32 %v3073_v15, 16  ;;  %v1010_v5 = vshrl.u32 %v3076_v16, 16  ;;  %v1029_v12 = vperm.slane %v1008_v0, %v3069_v13 }
  0xe7   : > { %1396 = vrot.lane.b32.xlu0 %v3073_v15, %s2809_s8  ;;  %1394 = vrot.lane.b32.xlu2 %v3076_v16, %s2809_s8  ;;  %v401_v28 = vperm.slane %v393_v21, %v3167_v17  ;;  %v414_v54 = vrot.slane %v3192_v47, 4  ;;  %v403_v45 = vsel %vm370_vm8, %v402_v63, %v379_v25 }
  0xe8   : > { %2001 = vrot.lane.b32.xlu1 %v1600_v55, %s2809_s8  ;;  %v976_v55 = vrot.slane %v974_v32, 1  ;;  %v404_v32 = vrot.slane %v379_v25, 4  ;;  %v1012_v14 = vpack.i.b16 %v1011_v2, %v1010_v5  ;;  %v1034_v22 = vrot.slane %v1029_v12, 4 }
  0xe9   : > { %v416_v34 = vrot.slane %v401_v28, 4  ;;  %v415_v58 = vsel %vm370_vm8, 0, %v414_v54 }
  0xea   : > { %v3150_v8 = vsel %vm957_vm7, %v972_v57, %v976_v55  ;;  %v405_v40 = vsel %vm370_vm8, %v389_v35, %v404_v32  ;;  %v431_v55 = vperm.slane %v423_v51, %v3069_v13  ;;  %v1002_v57 = vshrl.u32 %v3107_v42, 16 }
  0xeb   : > { %v417_v43 = vsel %vm370_vm8, 0, %v416_v34  ;;  %v413_v50 = vperm.slane %v405_v40, %v3167_v17  ;;  %v1003_v56 = vshrl.u32 %v3150_v8, 16  ;;  %v1000_v19 = vpack.i.b16 %v3150_v8, %v3107_v42 }
  0xec   : > { %v455_v46 = vsel %vm370_vm8, %v454_v52, %v431_v55  ;;  %v456_v59 = vrot.slane %v431_v55, 4  ;;  %v1081_v26 = vperm.slane %v1012_v14, %v3069_v13  ;;  %v1025_v51 = vsel %vm370_vm8, %v3083_v20, %v1024_v36 }
  0xed   : > { %v420_v24 = vrot.slane %v413_v50, 4  ;;  %v3208_v60 = vpack.i.b16 %v1003_v56, %v1002_v57  ;;  %v461_v62 = vperm.slane %v455_v46, %v3167_v17  ;;  %v3307_v36 = vperm.slane %v3097_v37, %v3167_v17 }
  0xee   : > { %v457_v4 = vsel %vm370_vm8, %v441_v41, %v456_v59  ;;  %v1086_v52 = vrot.slane %v1081_v26, 4  ;;  %v3323_v37 = vperm.slane %v3110_v44, %v3167_v17 }
  0xef   : > { %1194 = vrot.lane.b32.xlu0 %v3076_v16, %s2808_s7  ;;  %1390 = vrot.lane.b32.xlu2 %v3107_v42, %s2809_s8  ;;  %v421_v61 = vsel %vm370_vm8, 0, %v420_v24  ;;  %v470_v9 = vrot.slane %v461_v62, 4  ;;  %v1071_v23 = vperm.slane %v3208_v60, %v3069_v13  ;;  %v465_v18 = vperm.slane %v457_v4, %v3167_v17  ;;  %4620 = vst [vmem:[#allocation24_spill] sm:$0xff] %v3307_v36 }
  0xf0   : > { %1799 = vrot.lane.b32.xlu1 %v3031_v48, %s2808_s7  ;;  %v1655_v48 = vrot.slane %v1642_v53, 4  ;;  %v466_v53 = vrot.slane %v449_v27, 4  ;;  %v1033_v24 = vperm.slane %v1025_v51, %v3069_v13  ;;  %v1066_v46 = vrot.slane %v3208_v60, 4  ;;  %4621 = vst [vmem:[#allocation25_spill] sm:$0xff] %v3323_v37 }
  0xf1   : > { %v471_v16 = vsel %vm370_vm8, 0, %v470_v9  ;;  %v1088_v21 = vrot.slane %v1071_v23, 4 }
  0xf2   : > { %v3136_v1 = vsel %vm370_vm8, %v1655_v48, %v1632_v49  ;;  %v469_v49 = vsel %vm370_vm8, 0, %v468_v38  ;;  %v467_v48 = vsel %vm370_vm8, 0, %v466_v53  ;;  %v472_v38 = vrot.slane %v465_v18, 4 }
  0xf3   : > { %v1067_v0 = vsel %vm370_vm8, %v3083_v20, %v1066_v46  ;;  %v1046_v2 = vrot.slane %v1033_v24, 4 }
  0xf4   : > { %v1075_v9 = vperm.slane %v1067_v0, %v3069_v13 }
  0xf7   : > { %1190 = vrot.lane.b32.xlu2 %v3107_v42, %s2808_s7  ;;  %1392 = vrot.lane.b32.xlu0 %v3150_v8, %s2809_s8 }
  0xf8   : > { %1196 = vrot.lane.b32.xlu1 %v3073_v15, %s2808_s7  ;;  %v3228_v15 = vperm.slane %v403_v45, %v3167_v17 }
  0xfa   : > { %v418_v42 = vrot.slane %v3228_v15, 4 }
  0xfc   : > { %v419_v31 = vsel %vm370_vm8, 0, %v418_v42 }
  0xff   : > { %1192 = vrot.lane.b32.xlu0 %v3150_v8, %s2808_s7  ;;  %475 = vrot.lane.b32.xlu2 %v449_v27, %s2813_s9  ;;  %v1019_v27 = vperm.slane %v1000_v19, %v3069_v13  ;;  %v1089_v8 = vsel %vm370_vm8, %v1081_v26, %v1088_v21 }
 0x100   : > { %484 = vrot.lane.b32.xlu1 %v401_v28, %s2814_s26  ;;  %v1014_v28 = vrot.slane %v1000_v19, 4  ;;  %v1097_v30 = vperm.slane %v1089_v8, %v3167_v17 }
 0x101   : > { %v1036_v32 = vrot.slane %v1019_v27, 4 }
 0x102   : > { %v1015_v34 = vsel %vm370_vm8, %v3083_v20, %v1014_v28  ;;  %v1112_v45 = vrot.slane %v1097_v30, 4 }
 0x103   : > { %v1037_v39 = vsel %vm370_vm8, %v1029_v12, %v1036_v32  ;;  %v1023_v41 = vperm.slane %v1015_v34, %v3069_v13 }
 0x105   : > { %v1048_v54 = vrot.slane %v1023_v41, 4 }
 0x107   : > { %487 = vrot.lane.b32.xlu2 %v453_v29, %s2815_s14  ;;  %490 = vrot.lane.b32.xlu0 %v417_v43, %s2816_s18  ;;  %v1035_v29 = vsel %vm370_vm8, %v1034_v22, %v1019_v27  ;;  %v1076_v43 = vrot.slane %v1012_v14, 4  ;;  %v1047_v14 = vsel %vm370_vm8, %v1046_v2, %v1023_v41 }
 0x108   : > { %493 = vrot.lane.b32.xlu1 %v469_v49, %s2817_s10  ;;  %v3246_v33 = vperm.slane %v1035_v29, %v3167_v17  ;;  %v1045_v49 = vperm.slane %v1037_v39, %v3167_v17  ;;  %v3290_v21 = vperm.slane %v1047_v14, %v3167_v17 }
 0x109   : > { %v1077_v55 = vsel %vm370_vm8, %v3083_v20, %v1076_v43 }
 0x10a   : > { %4618 = vst [vmem:[#allocation22_spill] sm:$0xff] %v3246_v33  ;;  %v1058_v40 = vrot.slane %v3246_v33, 4  ;;  %v1060_v57 = vrot.slane %v1045_v49, 4  ;;  %v1085_v59 = vperm.slane %v1077_v55, %v3069_v13  ;;  %v1062_v42 = vrot.slane %v3290_v21, 4 }
 0x10b   : > { %4619 = vst [vmem:[#allocation23_spill] sm:$0xff] %v3290_v21  ;;  %v3332_v55 = vperm.slane %v3136_v1, %v3167_v17 }
 0x10c   : > { %v1059_v53 = vsel %vm370_vm8, 0, %v1058_v40  ;;  %v1098_v60 = vrot.slane %v1085_v59, 4  ;;  %v1063_v29 = vsel %vm370_vm8, 0, %v1062_v42 }
 0x10d   : > { %4623 = vst [vmem:[#allocation27_spill] sm:$0xff] %v3332_v55 }
 0x10e   : > { %v1099_v12 = vsel %vm370_vm8, %v1098_v60, %v1075_v9 }
 0x10f   : > { %481 = vrot.lane.b32.xlu0 %v467_v48, %s2818_s5  ;;  %478 = vrot.lane.b32.xlu2 %v415_v58, %s2819_s13  ;;  %v1087_v48 = vsel %vm370_vm8, %v1086_v52, %v1071_v23  ;;  %v1049_v58 = vsel %vm370_vm8, %v1033_v24, %v1048_v54  ;;  %v1105_v19 = vperm.slane %v1099_v12, %v3167_v17 }
 0x110   : > { %511 = vrot.lane.b32.xlu1 %v421_v61, %s2816_s18  ;;  %v1093_v61 = vperm.slane %v1087_v48, %v3167_v17  ;;  %v1057_v63 = vperm.slane %v1049_v58, %v3167_v17 }
 0x111   : > { %v1114_v8 = vrot.slane %v1105_v19, 4 }
 0x112   : > { %v1110_v23 = vrot.slane %v1093_v61, 4  ;;  %v1064_v28 = vrot.slane %v1057_v63, 4 }
 0x114   : > { %v1065_v34 = vsel %vm370_vm8, 0, %v1064_v28 }
 0x117   : > { %508 = vrot.lane.b32.xlu0 %v465_v18, %s2815_s14  ;;  %505 = vrot.lane.b32.xlu2 %v413_v50, %s2814_s26  ;;  %v473_v50 = vsel %vm370_vm8, 0, %v472_v38  ;;  %v1111_v18 = vsel %vm370_vm8, 0, %v1110_v23 }
 0x118   : > { %502 = vrot.lane.b32.xlu1 %v471_v16, %s2818_s5  ;;  %v1113_v16 = vsel %vm370_vm8, 0, %v1112_v45 }
 0x119   : > { %v3234_v25 = vpop.permute.xlu2 %561 }
 0x11f   : > { %496 = vrot.lane.b32.xlu2 %v461_v62, %s2813_s9  ;;  %499 = vrot.lane.b32.xlu0 %v419_v31, %s2819_s13  ;;  %v1061_v62 = vsel %vm370_vm8, 0, %v1060_v57  ;;  %v1100_v31 = vrot.slane %v1075_v9, 4 }
 0x120   : > { %1131 = vrot.lane.b32.xlu1 %v1097_v30, %s2815_s14  ;;  %v1115_v30 = vsel %vm370_vm8, 0, %v1114_v8 }
 0x121   : > { %v3251_v35 = vpop.permute.xlu2 %761  ;;  %v1101_v43 = vsel %vm370_vm8, %v1085_v59, %v1100_v31  ;;  %v577_v59 = vshrl.u32 %v3234_v25, 16 }
 0x127   : > { %514 = vrot.lane.b32.xlu2 %v473_v50, %s2817_s10  ;;  %1128 = vrot.lane.b32.xlu0 %v1045_v49, %s2814_s26  ;;  %v1667_v50 = vrot.slane %v3307_v36, 4 }
 0x128   : > { %1122 = vrot.lane.b32.xlu1 %v1059_v53, %s2819_s13  ;;  %v3326_v53 = vperm.slane %v1101_v43, %v3167_v17 }
 0x129   : > { %v3266_v56 = vpop.permute.xlu2 %2005  ;;  %v1668_v46 = vsel %vm370_vm8, 0, %v1667_v50 }
 0x12a   : > { %4622 = vst [vmem:[#allocation26_spill] sm:$0xff] %v3326_v53 }
 0x12f   : > { %1134 = vrot.lane.b32.xlu2 %v1061_v62, %s2816_s18  ;;  %1119 = vrot.lane.b32.xlu0 %v1093_v61, %s2813_s9 }
 0x130   : > { %1149 = vrot.lane.b32.xlu1 %v1057_v63, %s2814_s26  ;;  %v1671_v63 = vrot.slane %v3332_v55, 4 }
 0x131   : > { %v3281_v4 = vpop.permute.xlu2 %1805  ;;  %v558_v5 = vpop.permute.xlu0 %557 }
 0x132   : > { %v569_v51 = vshrl.u32 %v558_v5, 16  ;;  %v1672_v12 = vsel %vm370_vm8, 0, %v1671_v63 }
 0x137   : > { %1125 = vrot.lane.b32.xlu2 %v1111_v18, %s2818_s5  ;;  %1137 = vrot.lane.b32.xlu0 %v1113_v16, %s2817_s10  ;;  %v777_v16 = vshrl.u32 %v3251_v35, 16 }
 0x138   : > { %1140 = vrot.lane.b32.xlu1 %v1105_v19, %s2813_s9 }
 0x139   : > { %v3295_v22 = vpop.permute.xlu2 %1801  ;;  %v564_v26 = vpop.permute.xlu0 %563 }
 0x13a   : > { %v560_v27 = vpop.permute.xlu1 %559  ;;  %v3319_v52 = vpack.i.b16 %v564_v26, %v3234_v25  ;;  %v578_v44 = vshrl.u32 %v564_v26, 16  ;;  %v3365_v25 = vperm.slane %v3153_v10, %v3167_v17 }
 0x13b   : > { %v3300_v32 = vpack.i.b16 %v560_v27, %v558_v5  ;;  %v570_v40 = vshrl.u32 %v560_v27, 16 }
 0x13c   : > { %v596_v57 = vperm.slane %v3319_v52, %v3069_v13  ;;  %v3357_v2 = vpack.i.b16 %v578_v44, %v577_v59  ;;  %4624 = vst [vmem:[#allocation28_spill] sm:$0xff] %v3365_v25 }
 0x13d   : > { %v3315_v49 = vperm.slane %v3300_v32, %v3069_v13  ;;  %v3328_v54 = vpack.i.b16 %v570_v40, %v569_v51 }
 0x13e   : > { %v648_v10 = vperm.slane %v3357_v2, %v3069_v13 }
 0x13f   : > { %1143 = vrot.lane.b32.xlu2 %v1063_v29, %s2819_s13  ;;  %1146 = vrot.lane.b32.xlu0 %v1115_v30, %s2818_s5  ;;  %v603_v24 = vrot.slane %v3315_v49, 4  ;;  %v638_v61 = vperm.slane %v3328_v54, %v3069_v13 }
 0x140   : > { %1155 = vrot.lane.b32.xlu1 %v1065_v34, %s2816_s18  ;;  %v653_v43 = vrot.slane %v648_v10, 4 }
 0x141   : > { %v3310_v38 = vpop.permute.xlu2 %1394  ;;  %v758_v39 = vpop.permute.xlu0 %757  ;;  %v604_v60 = vsel %vm370_vm8, %v596_v57, %v603_v24  ;;  %v655_v18 = vrot.slane %v638_v61, 4 }
 0x142   : > { %v760_v41 = vpop.permute.xlu1 %759  ;;  %v769_v9 = vshrl.u32 %v758_v39, 16  ;;  %v612_v14 = vperm.slane %v604_v60, %v3167_v17  ;;  %v654_v60 = vsel %vm370_vm8, %v653_v43, %v638_v61  ;;  %v1820_v43 = vshrl.u32 %v3281_v4, 16 }
 0x143   : > { %v3343_v48 = vpack.i.b16 %v760_v41, %v758_v39  ;;  %v770_v5 = vshrl.u32 %v760_v41, 16  ;;  %v656_v30 = vsel %vm370_vm8, %v648_v10, %v655_v18  ;;  %v581_v39 = vrot.slane %v3300_v32, 4 }
 0x144   : > { %v601_v41 = vrot.slane %v596_v57, 4  ;;  %v3402_v50 = vperm.slane %v656_v30, %v3167_v17  ;;  %v633_v57 = vrot.slane %v3328_v54, 4  ;;  %v591_v54 = vrot.slane %v3319_v52, 4 }
 0x145   : > { %v3361_v23 = vperm.slane %v3343_v48, %v3069_v13  ;;  %v3379_v26 = vpack.i.b16 %v770_v5, %v769_v9  ;;  %v582_v32 = vsel %vm370_vm8, %v3083_v20, %v581_v39  ;;  %v781_v61 = vrot.slane %v3343_v48, 4 }
 0x146   : > { %v602_v5 = vsel %vm370_vm8, %v601_v41, %v3315_v49  ;;  %v634_v30 = vsel %vm370_vm8, %v3083_v20, %v633_v57  ;;  %v643_v48 = vrot.slane %v3357_v2, 4  ;;  %v2020_v41 = vshrl.u32 %v3266_v56, 16 }
 0x147   : > { %1728 = vrot.lane.b32.xlu2 %v3323_v37, %s2813_s9  ;;  %1152 = vrot.lane.b32.xlu0 %v3326_v53, %s2815_s14  ;;  %v803_v27 = vrot.slane %v3361_v23, 4  ;;  %v838_v40 = vperm.slane %v3379_v26, %v3069_v13  ;;  %v833_v52 = vrot.slane %v3379_v26, 4 }
 0x148   : > { %1731 = vrot.lane.b32.xlu1 %v1668_v46, %s2819_s13 }
 0x149   : > { %v3345_v1 = vpop.permute.xlu2 %1390  ;;  %v764_v58 = vpop.permute.xlu0 %763  ;;  %v855_v44 = vrot.slane %v838_v40, 4 }
 0x14a   : > { %v3350_v62 = vpop.permute.xlu1 %2003  ;;  %v3354_v0 = vpack.i.b16 %v764_v58, %v3251_v35  ;;  %v778_v45 = vshrl.u32 %v764_v58, 16  ;;  %v627_v35 = vrot.slane %v612_v14, 4  ;;  %v1410_v58 = vshrl.u32 %v3310_v38, 16 }
 0x14c   : > { %v3371_v19 = vperm.slane %v3354_v0, %v3069_v13  ;;  %v3387_v28 = vpack.i.b16 %v778_v45, %v777_v16  ;;  %v628_v24 = vsel %vm370_vm8, 0, %v627_v35  ;;  %v3429_v16 = vperm.slane %v582_v32, %v3069_v13 }
 0x14e   : > { %v804_v34 = vsel %vm370_vm8, %v3371_v19, %v803_v27  ;;  %v848_v51 = vperm.slane %v3387_v28, %v3069_v13  ;;  %v660_v27 = vperm.slane %v654_v60, %v3167_v17  ;;  %v615_v26 = vrot.slane %v3429_v16, 4 }
 0x14f   : > { %1752 = vrot.lane.b32.xlu2 %v1672_v12, %s2819_s13  ;;  %1749 = vrot.lane.b32.xlu0 %v3365_v25, %s2813_s9  ;;  %v812_v46 = vperm.slane %v804_v34, %v3167_v17  ;;  %v592_v34 = vsel %vm370_vm8, %v3083_v20, %v591_v54  ;;  %v3486_v54 = vpack.i.b16 %v3266_v56, %v3350_v62  ;;  %v843_v56 = vrot.slane %v3387_v28, 4 }
 0x150   : > { %695 = vrot.lane.b32.xlu1 %v612_v14, %s2814_s26  ;;  %v856_v14 = vsel %vm370_vm8, %v848_v51, %v855_v44  ;;  %v853_v39 = vrot.slane %v848_v51, 4  ;;  %v677_v32 = vrot.slane %v660_v27, 4  ;;  %v3463_v44 = vperm.slane %v634_v30, %v3069_v13 }
 0x151   : > { %v3383_v42 = vpop.permute.xlu2 %1190  ;;  %v3385_v8 = vpop.permute.xlu0 %1999  ;;  %v827_v18 = vrot.slane %v812_v46, 4  ;;  %v3435_v49 = vperm.slane %v856_v14, %v3167_v17 }
 0x152   : > { %v3389_v29 = vpop.permute.xlu1 %1803  ;;  %v854_v14 = vsel %vm370_vm8, %v853_v39, %v838_v40  ;;  %v667_v40 = vrot.slane %v3463_v44, 4  ;;  %v791_v39 = vrot.slane %v3354_v0, 4 }
 0x153   : > { %v3394_v31 = vpack.i.b16 %v3281_v4, %v3389_v29  ;;  %v828_v35 = vsel %vm370_vm8, 0, %v827_v18  ;;  %v3467_v4 = vperm.slane %v592_v34, %v3069_v13 }
 0x157   : > { %698 = vrot.lane.b32.xlu2 %v3402_v50, %s2815_s14  ;;  %701 = vrot.lane.b32.xlu0 %v628_v24, %s2816_s18  ;;  %v782_v24 = vsel %vm370_vm8, %v3083_v20, %v781_v61  ;;  %v616_v61 = vsel %vm370_vm8, %v3467_v4, %v615_v26 }
 0x158   : > { %895 = vrot.lane.b32.xlu1 %v812_v46, %s2814_s26  ;;  %v3482_v18 = vperm.slane %v782_v24, %v3069_v13  ;;  %v3516_v0 = vperm.slane %v616_v61, %v3167_v17 }
 0x159   : > { %v3416_v59 = vpop.permute.xlu2 %475  ;;  %v1397_v63 = vpop.permute.xlu0 %1396 }
 0x15a   : > { %v3421_v9 = vpop.permute.xlu1 %2001  ;;  %v3424_v45 = vpack.i.b16 %v1397_v63, %v3310_v38  ;;  %v1411_v12 = vshrl.u32 %v1397_v63, 16  ;;  %v3439_v38 = vperm.slane %v602_v5, %v3167_v17  ;;  %v2019_v63 = vshrl.u32 %v3350_v62, 16 }
 0x15b   : > { %v644_v5 = vsel %vm370_vm8, %v3083_v20, %v643_v48  ;;  %v801_v48 = vrot.slane %v3371_v19, 4  ;;  %v860_v62 = vperm.slane %v854_v14, %v3167_v17  ;;  %v1402_v19 = vshrl.u32 %v3345_v1, 16 }
 0x15c   : > { %v3431_v10 = vpack.i.b16 %v1411_v12, %v1410_v58  ;;  %4625 = vst [vmem:[#allocation29_spill] sm:$0xff] %v3439_v38  ;;  %v625_v51 = vrot.slane %v3439_v38, 4  ;;  %v834_v58 = vsel %vm370_vm8, %v3083_v20, %v833_v52  ;;  %v3497_v34 = vpack.i.b16 %v2020_v41, %v2019_v63 }
 0x15d   : > { %v3492_v30 = vperm.slane %v834_v58, %v3069_v13  ;;  %v3507_v26 = vperm.slane %v644_v5, %v3069_v13  ;;  %v3511_v41 = vperm.slane %v3486_v54, %v3069_v13  ;;  %v519_v24 = vsel %vm516_vm9, %v3192_v47, %v3416_v59 }
 0x15e   : > { %v626_v52 = vsel %vm370_vm8, 0, %v625_v51  ;;  %v3528_v5 = vperm.slane %v3497_v34, %v3069_v13  ;;  %v844_v14 = vsel %vm370_vm8, %v3083_v20, %v843_v56  ;;  %v802_v47 = vsel %vm370_vm8, %v801_v48, %v3361_v23 }
 0x15f   : > { %898 = vrot.lane.b32.xlu2 %v3435_v49, %s2815_s14  ;;  %901 = vrot.lane.b32.xlu0 %v828_v35, %s2816_s18  ;;  %v678_v35 = vsel %vm370_vm8, 0, %v677_v32  ;;  %v668_v58 = vsel %vm370_vm8, %v3507_v26, %v667_v40  ;;  %v867_v63 = vrot.slane %v3492_v30, 4  ;;  %v792_v59 = vsel %vm370_vm8, %v3083_v20, %v791_v39 }
 0x160   : > { %686 = vrot.lane.b32.xlu1 %v660_v27, %s2813_s9  ;;  %v679_v27 = vrot.slane %v3402_v50, 4  ;;  %v1819_v50 = vshrl.u32 %v3389_v29, 16  ;;  %v1833_v29 = vrot.slane %v3394_v31, 4  ;;  %v3555_v23 = vperm.slane %v668_v58, %v3167_v17 }
 0x161   : > { %v3457_v46 = vpop.permute.xlu2 %487  ;;  %v3459_v2 = vpop.permute.xlu0 %1194  ;;  %v879_v48 = vrot.slane %v3435_v49, 4  ;;  %v3561_v39 = vperm.slane %v802_v47, %v3167_v17  ;;  %v2095_v56 = vrot.slane %v3528_v5, 4  ;;  %v3572_v58 = vpack.i.b16 %v3421_v9, %v3385_v8 }
 0x162   : > { %v3472_v60 = vpop.permute.xlu1 %1799  ;;  %v680_v28 = vsel %vm370_vm8, 0, %v679_v27  ;;  %v877_v57 = vrot.slane %v860_v62, 4 }
 0x163   : > { %v3478_v12 = vpack.i.b16 %v3295_v22, %v3472_v60  ;;  %4626 = vst [vmem:[#allocation30_spill] sm:$0xff] %v3561_v39  ;;  %v825_v53 = vrot.slane %v3561_v39, 4  ;;  %v1811_v37 = vshrl.u32 %v3472_v60, 16 }
 0x164   : > { %4627 = vst [vmem:[#allocation31_spill] sm:$0xff] %v3572_v58 }
 0x167   : > { %689 = vrot.lane.b32.xlu2 %v626_v52, %s2819_s13  ;;  %692 = vrot.lane.b32.xlu0 %v678_v35, %s2818_s5  ;;  %v3541_v52 = vpack.i.b16 %v1820_v43, %v1819_v50  ;;  %v2012_v35 = vshrl.u32 %v3421_v9, 16  ;;  %v1834_v43 = vsel %vm370_vm8, %v3083_v20, %v1833_v29  ;;  %v3564_v50 = vperm.slane %v844_v14, %v3069_v13 }
 0x168   : > { %886 = vrot.lane.b32.xlu1 %v860_v62, %s2813_s9  ;;  %v1424_v62 = vrot.slane %v3424_v45, 4  ;;  %v3603_v9 = vperm.slane %v3572_v58, %v3069_v13 }
 0x169   : > { %v479_v51 = vpop.permute.xlu2 %478  ;;  %v1393_v32 = vpop.permute.xlu0 %1392  ;;  %v3576_v29 = vperm.slane %v3541_v52, %v3069_v13 }
 0x16a   : > { %v3532_v61 = vpop.permute.xlu1 %1196  ;;  %v3535_v27 = vsel %vm520_vm10, %v519_v24, %v479_v51  ;;  %v3551_v24 = vperm.slane %v3394_v31, %v3069_v13  ;;  %v2011_v51 = vshrl.u32 %v3385_v8, 16  ;;  %v3568_v31 = vperm.slane %v792_v59, %v3069_v13 }
 0x16b   : > { %v3546_v40 = vpack.i.b16 %v3532_v61, %v3459_v2  ;;  %v1400_v47 = vpack.i.b16 %v1393_v32, %v3345_v1  ;;  %v1403_v14 = vshrl.u32 %v1393_v32, 16  ;;  %v3586_v59 = vperm.slane %v1834_v43, %v3069_v13 }
 0x16c   : > { %v3578_v49 = vpack.i.b16 %v2012_v35, %v2011_v51  ;;  %v1476_v1 = vrot.slane %v3431_v10, 4  ;;  %v880_v51 = vsel %vm370_vm8, 0, %v879_v48  ;;  %v868_v43 = vsel %vm370_vm8, %v3564_v50, %v867_v63 }
 0x16d   : > { %v878_v48 = vsel %vm370_vm8, 0, %v877_v57  ;;  %v1404_v6 = vpack.i.b16 %v1403_v14, %v1402_v19  ;;  %v1414_v3 = vrot.slane %v1400_v47, 4  ;;  %v1425_v39 = vsel %vm370_vm8, %v3083_v20, %v1424_v62 }
 0x16e   : > { %v3617_v63 = vperm.slane %v3578_v49, %v3069_v13  ;;  %v3626_v38 = vperm.slane %v868_v43, %v3167_v17  ;;  %v815_v57 = vrot.slane %v3482_v18, 4  ;;  %v1477_v7 = vsel %vm370_vm8, %v3083_v20, %v1476_v1 }
 0x16f   : > { %716 = vrot.lane.b32.xlu2 %v3516_v0, %s2814_s26  ;;  %719 = vrot.lane.b32.xlu0 %v3555_v23, %s2815_s14  ;;  %v1419_v19 = vperm.slane %v1400_v47, %v3069_v13  ;;  %v826_v14 = vsel %vm370_vm8, 0, %v825_v53  ;;  %v3639_v25 = vperm.slane %v1425_v39, %v3069_v13  ;;  %v1415_v1 = vsel %vm370_vm8, %v3083_v20, %v1414_v3 }
 0x170   : > { %704 = vrot.lane.b32.xlu1 %v680_v28, %s2817_s10  ;;  %v1429_v28 = vperm.slane %v3424_v45, %v3069_v13  ;;  %v3623_v45 = vperm.slane %v3431_v10, %v3069_v13  ;;  %v816_v43 = vsel %vm370_vm8, %v3568_v31, %v815_v57  ;;  %v1466_v36 = vrot.slane %v1404_v6, 4 }
 0x171   : > { %v3593_v32 = vpop.permute.xlu2 %505  ;;  %v3595_v35 = vpop.permute.xlu0 %1192  ;;  %v2096_v53 = vsel %vm370_vm8, %v2095_v56, %v3617_v63  ;;  %v3648_v60 = vperm.slane %v1477_v7, %v3069_v13  ;;  %v1823_v57 = vrot.slane %v3478_v12, 4  ;;  %v4628_v3 = vshrl.u32 %v3295_v22, 16 }
 0x172   : > { %v3607_v8 = vpop.permute.xlu1 %484  ;;  %v3611_v11 = vpack.i.b16 %v3595_v35, %v3383_v42  ;;  %v1434_v10 = vrot.slane %v1429_v28, 4  ;;  %v1486_v47 = vrot.slane %v3623_v45, 4  ;;  %v3664_v62 = vperm.slane %v816_v43, %v3167_v17 }
 0x173   : > { %v3656_v55 = vpack.i.b16 %v4628_v3, %v1811_v37  ;;  %v1224_v21 = vrot.slane %v3546_v40, 4  ;;  %v1423_v39 = vperm.slane %v1415_v1, %v3069_v13  ;;  %v3671_v22 = vperm.slane %v2096_v53, %v3167_v17 }
 0x174   : > { %v665_v37 = vrot.slane %v3507_v26, 4  ;;  %v1824_v43 = vsel %vm370_vm8, %v3083_v20, %v1823_v57  ;;  %v1214_v1 = vrot.slane %v3611_v11, 4  ;;  %v613_v3 = vrot.slane %v3467_v4, 4 }
 0x175   : > { %4629 = vst [vmem:[#allocation32_spill] sm:$0xff] %v3671_v22  ;;  %v1446_v53 = vrot.slane %v3639_v25, 4  ;;  %v3686_v58 = vperm.slane %v3656_v55, %v3069_v13  ;;  %v1225_v4 = vsel %vm370_vm8, %v3083_v20, %v1224_v21  ;;  %v1498_v57 = vrot.slane %v3648_v60, 4 }
 0x176   : > { %v631_v21 = vrot.slane %v3516_v0, 4  ;;  %v3735_v0 = vperm.slane %v1225_v4, %v3069_v13  ;;  %v614_v4 = vsel %vm370_vm8, %v613_v3, %v3429_v16 }
 0x177   : > { %892 = vrot.lane.b32.xlu0 %v878_v48, %s2818_s5  ;;  %889 = vrot.lane.b32.xlu2 %v826_v14, %s2819_s13  ;;  %v1436_v48 = vrot.slane %v1419_v19, 4  ;;  %v3659_v14 = vperm.slane %v1404_v6, %v3069_v13  ;;  %v1467_v6 = vsel %vm370_vm8, %v3083_v20, %v1466_v36  ;;  %v3690_v36 = vperm.slane %v3546_v40, %v3069_v13 }
 0x178   : > { %904 = vrot.lane.b32.xlu1 %v880_v51, %s2817_s10  ;;  %v3677_v51 = vsel %vm370_vm8, %v1434_v10, %v1419_v19  ;;  %v3702_v10 = vperm.slane %v1467_v6, %v3069_v13  ;;  %v3710_v40 = vperm.slane %v3611_v11, %v3069_v13  ;;  %v666_v11 = vsel %vm370_vm8, %v665_v37, %v3463_v44 }
 0x179   : > { %v3661_v56 = vpop.permute.xlu2 %496  ;;  %v491_v7 = vpop.permute.xlu0 %490  ;;  %4630 = vst [vmem:[#allocation33_spill] sm:$0xff] %v3677_v51  ;;  %v3694_v26 = vsel %vm370_vm8, %v1486_v47, %v3659_v14  ;;  %v3697_v19 = vsel %vm370_vm8, %v1429_v28, %v1436_v48  ;;  %v3706_v51 = vsel %vm370_vm8, %v1446_v53, %v1423_v39  ;;  %v3719_v28 = vperm.slane %v3478_v12, %v3069_v13 }
 0x17a   : > { %v3668_v33 = vpop.permute.xlu1 %493  ;;  %4631 = vst [vmem:[#allocation34_spill] sm:$0xff] %v3697_v19  ;;  %v1215_v47 = vsel %vm370_vm8, %v3083_v20, %v1214_v1  ;;  %v3729_v48 = vsel %vm370_vm8, %v1498_v57, %v3702_v10  ;;  %v3732_v6 = vperm.slane %v1824_v43, %v3069_v13  ;;  %v1234_v12 = vrot.slane %v3690_v36, 4 }
 0x17b   : > { %4632 = vst [vmem:[#allocation35_spill] sm:$0xff] %v3706_v51  ;;  %v865_v19 = vrot.slane %v3564_v50, 4  ;;  %v4634_v37 = vrot.slane %v3576_v29, 4  ;;  %v1448_v57 = vrot.slane %v1423_v39, 4  ;;  %v1203_v51 = vshrl.u32 %v3595_v35, 16 }
 0x17c   : > { %4633 = vst [vmem:[#allocation36_spill] sm:$0xff] %v3729_v48  ;;  %v3753_v48 = vperm.slane %v1215_v47, %v3069_v13  ;;  %v3765_v16 = vperm.slane %v666_v11, %v3167_v17  ;;  %v1488_v39 = vrot.slane %v3659_v14, 4  ;;  %v3780_v47 = vperm.slane %v614_v4, %v3167_v17 }
 0x17d   : > { %v1896_v43 = vsel %vm370_vm8, %v4634_v37, %v3686_v58  ;;  %v3769_v35 = vsel %vm370_vm8, %v3639_v25, %v1448_v57  ;;  %v4635_v11 = vrot.slane %v3603_v9, 4  ;;  %v4636_v14 = vrot.slane %v3551_v24, 4 }
 0x17e   : > { %v3776_v3 = vperm.slane %v1896_v43, %v3167_v17  ;;  %v4638_v57 = vrot.slane %v3497_v34, 4  ;;  %v2097_v34 = vrot.slane %v3617_v63, 4 }
 0x17f   : > { %919 = vrot.lane.b32.xlu0 %v3626_v38, %s2815_s14  ;;  %916 = vrot.lane.b32.xlu2 %v3664_v62, %s2814_s26  ;;  %v3787_v25 = vsel %vm370_vm8, %v3511_v41, %v4635_v11  ;;  %v1236_v11 = vrot.slane %v3710_v40, 4 }
 0x180   : > { %2128 = vrot.lane.b32.xlu1 %v3671_v22, %s2813_s9 }
 0x181   : > { %v3738_v53 = vpop.permute.xlu2 %514  ;;  %v482_v1 = vpop.permute.xlu0 %481 }
 0x182   : > { %v3741_v22 = vpop.permute.xlu1 %511  ;;  %v525_v44 = vsel %vm523_vm11, %v3535_v27, %v482_v1  ;;  %v3759_v27 = vsel %vm370_vm8, %v1234_v12, %v3710_v40  ;;  %v1211_v1 = vshrl.u32 %v3532_v61, 16  ;;  %v1246_v61 = vrot.slane %v3735_v0, 4 }
 0x183   : > { %v528_v50 = vsel %vm526_vm12, %v525_v44, %v3607_v8  ;;  %v2043_v12 = vrot.slane %v3511_v41, 4  ;;  %v4637_v44 = vshrl.u32 %v3383_v42, 16  ;;  %v2086_v41 = vsel %vm370_vm8, %v3083_v20, %v4638_v57 }
 0x184   : > { %v531_v37 = vsel %vm529_vm13, %v528_v50, %v3457_v46  ;;  %v813_v46 = vrot.slane %v3568_v31, 4  ;;  %v632_v31 = vsel %vm370_vm8, 0, %v631_v21  ;;  %v3805_v4 = vsel %vm370_vm8, %v1246_v61, %v3753_v48 }
 0x185   : > { %v3773_v8 = vsel %vm532_vm14, %v531_v37, %v491_v7  ;;  %v3793_v7 = vsel %vm370_vm8, %v4636_v14, %v3719_v28  ;;  %v1204_v43 = vpack.i.b16 %v1203_v51, %v4637_v44  ;;  %v4639_v42 = vshrl.u32 %v3459_v2, 16 }
 0x186   : > { %v866_v50 = vsel %vm370_vm8, %v865_v19, %v3492_v30  ;;  %v1855_v37 = vrot.slane %v3586_v59, 4  ;;  %v4640_v21 = vrot.slane %v3578_v49, 4  ;;  %v629_v30 = vrot.slane %v3780_v47, 4 }
 0x187   : > { %1928 = vrot.lane.b32.xlu0 %v3776_v3, %s2813_s9  ;;  %707 = vrot.lane.b32.xlu2 %v3765_v16, %s2813_s9  ;;  %v1212_v51 = vpack.i.b16 %v1211_v1, %v4639_v42  ;;  %v3827_v1 = vsel %vm370_vm8, %v3623_v45, %v1488_v39  ;;  %v831_v19 = vrot.slane %v3664_v62, 4  ;;  %v814_v49 = vsel %vm370_vm8, %v813_v46, %v3482_v18 }
 0x188   : > { %722 = vrot.lane.b32.xlu1 %v632_v31, %s2816_s18  ;;  %v2076_v61 = vsel %vm370_vm8, %v3083_v20, %v4640_v21  ;;  %v3835_v63 = vsel %vm370_vm8, %v1855_v37, %v3732_v6  ;;  %v1845_v40 = vrot.slane %v3719_v28, 4  ;;  %v1875_v31 = vrot.slane %v3656_v55, 4 }
 0x189   : > { %v3823_v14 = vpop.permute.xlu2 %1134  ;;  %v509_v2 = vpop.permute.xlu0 %508  ;;  %v1266_v57 = vrot.slane %v1204_v43, 4  ;;  %v3840_v45 = vperm.slane %v866_v50, %v3167_v17  ;;  %v1276_v39 = vrot.slane %v1212_v51, 4  ;;  %v2044_v42 = vsel %vm370_vm8, %v2043_v12, %v3603_v9 }
 0x18a   : > { %v503_v44 = vpop.permute.xlu1 %502  ;;  %v3845_v62 = vperm.slane %v2076_v61, %v3069_v13  ;;  %v1500_v18 = vrot.slane %v3702_v10, 4  ;;  %v1271_v46 = vperm.slane %v1204_v43, %v3069_v13  ;;  %v3850_v37 = vperm.slane %v814_v49, %v3167_v17 }
 0x18b   : > { %v3854_v55 = vsel %vm370_vm8, %v3690_v36, %v1236_v11  ;;  %v3858_v28 = vsel %vm370_vm8, %v3528_v5, %v2097_v34  ;;  %v3861_v9 = vperm.slane %v2086_v41, %v3069_v13  ;;  %v1885_v12 = vrot.slane %v3541_v52, 4 }
 0x18c   : > { %v630_v10 = vsel %vm370_vm8, 0, %v629_v30  ;;  %v3867_v43 = vsel %vm370_vm8, %v3648_v60, %v1500_v18  ;;  %v1876_v50 = vsel %vm370_vm8, %v3083_v20, %v1875_v31  ;;  %v1267_v36 = vsel %vm370_vm8, %v3083_v20, %v1266_v57 }
 0x18d   : > { %v832_v5 = vsel %vm370_vm8, 0, %v831_v19  ;;  %v3878_v52 = vperm.slane %v2044_v42, %v3167_v17  ;;  %v1277_v60 = vsel %vm370_vm8, %v3083_v20, %v1276_v39  ;;  %v1248_v41 = vrot.slane %v3753_v48, 4 }
 0x18e   : > { %v2109_v21 = vrot.slane %v3845_v62, 4  ;;  %v3887_v61 = vsel %vm370_vm8, %v3551_v24, %v1845_v40  ;;  %v1288_v34 = vrot.slane %v1271_v46, 4  ;;  %v540_v11 = vsel %vm516_vm9, %v3228_v15, %v3661_v56 }
 0x18f   : > { %710 = vrot.lane.b32.xlu0 %v630_v10, %s2819_s13  ;;  %907 = vrot.lane.b32.xlu2 %v3840_v45, %s2813_s9  ;;  %v683_v49 = vrot.slane %v3555_v23, 4  ;;  %v829_v31 = vrot.slane %v3850_v37, 4  ;;  %v3900_v39 = vperm.slane %v1267_v36, %v3069_v13  ;;  %v3904_v24 = vsel %vm370_vm8, %v3735_v0, %v1248_v41 }
 0x190   : > { %922 = vrot.lane.b32.xlu1 %v832_v5, %s2816_s18  ;;  %v3908_v15 = vsel %vm370_vm8, %v3861_v9, %v2109_v21  ;;  %v1281_v56 = vperm.slane %v1212_v51, %v3069_v13  ;;  %v2067_v40 = vrot.slane %v3878_v52, 4  ;;  %v1886_v42 = vsel %vm370_vm8, %v3083_v20, %v1885_v12 }
 0x191   : > { %v3892_v30 = vpop.permute.xlu2 %1125  ;;  %v500_v19 = vpop.permute.xlu0 %499  ;;  %v1897_v18 = vrot.slane %v3686_v58, 4  ;;  %v1857_v0 = vrot.slane %v3732_v6, 4  ;;  %v3920_v36 = vperm.slane %v1277_v60, %v3069_v13  ;;  %v3924_v51 = vperm.slane %v1876_v50, %v3069_v13 }
 0x192   : > { %v3896_v57 = vpop.permute.xlu1 %1131  ;;  %v542_v48 = vsel %vm520_vm10, %v540_v11, %v500_v19  ;;  %v684_v12 = vsel %vm370_vm8, 0, %v683_v49  ;;  %v830_v58 = vsel %vm370_vm8, 0, %v829_v31  ;;  %v1300_v6 = vrot.slane %v3900_v39, 4 }
 0x193   : > { %v544_v23 = vsel %vm523_vm11, %v542_v48, %v503_v44  ;;  %v3927_v44 = vsel %vm370_vm8, %v1281_v56, %v1288_v34  ;;  %v1286_v50 = vrot.slane %v1281_v56, 4  ;;  %v3946_v41 = vsel %vm370_vm8, %v3576_v29, %v1897_v18  ;;  %v4642_v18 = vld [vmem:[#allocation31_spill] sm:$0xff] }
 0x194   : > { %v546_v10 = vsel %vm526_vm12, %v544_v23, %v3593_v32  ;;  %v3933_v32 = vsel %vm370_vm8, %v3586_v59, %v1857_v0  ;;  %v3942_v60 = vsel %vm370_vm8, %v3920_v36, %v1300_v6  ;;  %v1894_v59 = vperm.slane %v1886_v42, %v3069_v13 }
 0x195   : > { %v548_v5 = vsel %vm529_vm13, %v546_v10, %v509_v2  ;;  %v2068_v2 = vsel %vm370_vm8, 0, %v2067_v40  ;;  %v1909_v11 = vrot.slane %v3924_v51, 4  ;;  %v883_v49 = vrot.slane %v3626_v38, 4 }
 0x196   : > { %v1287_v31 = vsel %vm370_vm8, %v1286_v50, %v1271_v46  ;;  %v681_v48 = vrot.slane %v3765_v16, 4  ;;  %v3962_v23 = vsel %vm535_vm15, %v3773_v8, %v3668_v33  ;;  %v2033_v40 = vrot.slane %v3486_v54, 4  ;;  %v4641_v46 = vld [vmem:[#allocation33_spill] sm:$0xff] }
 0x197   : > { %725 = vrot.lane.b32.xlu2 %v684_v12, %s2817_s10  ;;  %910 = vrot.lane.b32.xlu0 %v830_v58, %s2819_s13  ;;  %v3954_v56 = vsel %vm370_vm8, %v1894_v59, %v1909_v11  ;;  %v3957_v29 = vperm.slane %v1287_v31, %v3167_v17  ;;  %v884_v38 = vsel %vm370_vm8, 0, %v883_v49  ;;  %v3968_v42 = vperm.slane %v4641_v46, %v3167_v17  ;;  %v4643_v58 = vld [vmem:[#allocation22_spill] sm:$0xff] }
 0x198   : > { %2131 = vrot.lane.b32.xlu1 %v2068_v2, %s2819_s13  ;;  %v682_v16 = vsel %vm370_vm8, 0, %v681_v48  ;;  %v2023_v10 = vrot.slane %v4642_v18, 4  ;;  %v2107_v33 = vrot.slane %v3861_v9, 4  ;;  %v2034_v0 = vsel %vm370_vm8, %v3083_v20, %v2033_v40 }
 0x199   : > { %v1144_v21 = vpop.permute.xlu2 %1143  ;;  %v1129_v34 = vpop.permute.xlu0 %1128  ;;  %v1458_v50 = vrot.slane %v3968_v42, 4  ;;  %v881_v49 = vrot.slane %v3840_v45, 4  ;;  %v3991_v48 = vperm.slane %v2034_v0, %v3069_v13  ;;  %v1493_v0 = vperm.slane %v3694_v26, %v3167_v17 }
 0x19a   : > { %v1123_v19 = vpop.permute.xlu1 %1122  ;;  %v2108_v2 = vsel %vm370_vm8, %v2107_v33, %v3845_v62  ;;  %v2024_v9 = vsel %vm370_vm8, %v3083_v20, %v2023_v10  ;;  %v1298_v26 = vrot.slane %v3920_v36, 4  ;;  %v4646_v36 = vld [vmem:[#allocation35_spill] sm:$0xff] }
 0x19b   : > { %v2114_v40 = vperm.slane %v2108_v2, %v3167_v17  ;;  %v1459_v62 = vsel %vm370_vm8, 0, %v1458_v50  ;;  %v3999_v45 = vperm.slane %v2024_v9, %v3069_v13  ;;  %v882_v20 = vsel %vm370_vm8, 0, %v881_v49 }
 0x19c   : > { %v2055_v13 = vrot.slane %v3991_v48, 4 }
 0x19f   : > { %925 = vrot.lane.b32.xlu2 %v884_v38, %s2817_s10  ;;  %1319 = vrot.lane.b32.xlu0 %v3957_v29, %s2813_s9 }
 0x1a0   : > { %713 = vrot.lane.b32.xlu1 %v682_v16, %s2818_s5  ;;  %v1907_v16 = vrot.slane %v1894_v59, 4 }
 0x1a1   : > { %v1729_v54 = vpop.permute.xlu2 %1728  ;;  %v1120_v8 = vpop.permute.xlu0 %1119 }
 0x1a2   : > { %v1150_v12 = vpop.permute.xlu1 %1149  ;;  %v1162_v6 = vsel %vm516_vm9, %v4643_v58, %v1120_v8 }
 0x1a3   : > { %v1164_v11 = vsel %vm520_vm10, %v1162_v6, %v1123_v19 }
 0x1a4   : > { %v1166_v31 = vsel %vm523_vm11, %v1164_v11, %v3892_v30 }
 0x1a5   : > { %v1168_v38 = vsel %vm526_vm12, %v1166_v31, %v1129_v34  ;;  %v550_v34 = vsel %vm532_vm14, %v548_v5, %v3741_v22  ;;  %v1908_v22 = vsel %vm370_vm8, %v1907_v16, %v3924_v51  ;;  %v2056_v5 = vsel %vm370_vm8, %v2055_v13, %v3999_v45 }
 0x1a6   : > { %v1170_v19 = vsel %vm529_vm13, %v1168_v38, %v3896_v57  ;;  %v4014_v18 = vsel %vm535_vm15, %v550_v34, %v3738_v53  ;;  %v4645_v53 = vld [vmem:[#allocation36_spill] sm:$0xff]  ;;  %v4031_v6 = vperm.slane %v1908_v22, %v3167_v17  ;;  %v4034_v2 = vperm.slane %v2056_v5, %v3167_v17 }
 0x1a7   : > { %2149 = vrot.lane.b32.xlu2 %v2114_v40, %s2813_s9  ;;  %1522 = vrot.lane.b32.xlu0 %v1459_v62, %s2819_s13  ;;  %v1172_v30 = vsel %vm532_vm14, %v1170_v19, %v3823_v14  ;;  %v4644_v14 = vld [vmem:[#allocation23_spill] sm:$0xff]  ;;  %v1505_v58 = vperm.slane %v4645_v53, %v3167_v17  ;;  %v1299_v31 = vsel %vm370_vm8, %v1298_v26, %v3900_v39  ;;  %v4647_v34 = vld [vmem:[#allocation24_spill] sm:$0xff] }
 0x1a8   : > { %913 = vrot.lane.b32.xlu1 %v882_v20, %s2818_s5  ;;  %v2071_v49 = vrot.slane %v4034_v2, 4  ;;  %v4051_v20 = vperm.slane %v1299_v31, %v3167_v17  ;;  %v4077_v53 = vperm.slane %v3759_v27, %v3167_v17 }
 0x1a9   : > { %v4009_v46 = vpop.permute.xlu2 %1752  ;;  %v1138_v57 = vpop.permute.xlu0 %1137  ;;  %v1514_v9 = vrot.slane %v1505_v58, 4 }
 0x1aa   : > { %v1141_v10 = vpop.permute.xlu1 %1140  ;;  %v4017_v33 = vsel %vm535_vm15, %v1172_v30, %v1138_v57  ;;  %v2072_v62 = vsel %vm370_vm8, 0, %v2071_v49  ;;  %v4057_v30 = vperm.slane %v4646_v36, %v3167_v17  ;;  %v1771_v57 = vsel %vm516_vm9, %v4647_v34, %v1729_v54  ;;  %v4649_v49 = vld [vmem:[#allocation34_spill] sm:$0xff] }
 0x1ab   : > { %v1177_v8 = vsel %vm516_vm9, %v4644_v14, %v1141_v10  ;;  %v1515_v19 = vsel %vm370_vm8, 0, %v1514_v9  ;;  %v1510_v10 = vrot.slane %v1493_v0, 4  ;;  %v2123_v14 = vrot.slane %v2114_v40, 4 }
 0x1ac   : > { %v1179_v59 = vsel %vm520_vm10, %v1177_v8, %v1144_v21  ;;  %v1462_v22 = vrot.slane %v4057_v30, 4  ;;  %v4084_v9 = vperm.slane %v4649_v49, %v3167_v17 }
 0x1ad   : > { %v1511_v5 = vsel %vm370_vm8, 0, %v1510_v10  ;;  %v4108_v10 = vperm.slane %v3769_v35, %v3167_v17 }
 0x1ae   : > { %v1463_v54 = vsel %vm370_vm8, 0, %v1462_v22  ;;  %v4115_v22 = vperm.slane %v3793_v7, %v3167_v17  ;;  %v4128_v7 = vperm.slane %v3787_v25, %v3167_v17  ;;  %v2057_v25 = vrot.slane %v3999_v45, 4 }
 0x1af   : > { %1519 = vrot.lane.b32.xlu2 %v1493_v0, %s2813_s9  ;;  %1540 = vrot.lane.b32.xlu0 %v1505_v58, %s2813_s9 }
 0x1b0   : > { %1949 = vrot.lane.b32.xlu1 %v4031_v6, %s2813_s9  ;;  %v1867_v49 = vrot.slane %v4115_v22, 4  ;;  %v2058_v45 = vsel %vm370_vm8, %v3991_v48, %v2057_v25 }
 0x1b1   : > { %v4040_v51 = vpop.permute.xlu2 %698  ;;  %v1147_v21 = vpop.permute.xlu0 %1146 }
 0x1b2   : > { %v1156_v50 = vpop.permute.xlu1 %1155  ;;  %v1181_v11 = vsel %vm523_vm11, %v1179_v59, %v1147_v21  ;;  %v2124_v59 = vsel %vm370_vm8, 0, %v2123_v14  ;;  %v4648_v21 = vld [vmem:[#allocation32_spill] sm:$0xff] }
 0x1b3   : > { %v1183_v38 = vsel %vm526_vm12, %v1181_v11, %v1150_v12  ;;  %v2119_v26 = vrot.slane %v4648_v21, 4  ;;  %v1258_v11 = vrot.slane %v4077_v53, 4 }
 0x1b5   : > { %v2120_v31 = vsel %vm370_vm8, 0, %v2119_v26  ;;  %v1259_v27 = vsel %vm370_vm8, 0, %v1258_v11  ;;  %v4653_v26 = vld [vmem:[#allocation29_spill] sm:$0xff] }
 0x1b7   : > { %2152 = vrot.lane.b32.xlu2 %v2072_v62, %s2819_s13  ;;  %1546 = vrot.lane.b32.xlu0 %v1515_v19, %s2818_s5 }
 0x1b8   : > { %1340 = vrot.lane.b32.xlu1 %v4051_v20, %s2813_s9 }
 0x1b9   : > { %v4061_v39 = vpop.permute.xlu2 %898  ;;  %v1153_v12 = vpop.permute.xlu0 %1152 }
 0x1ba   : > { %v1732_v16 = vpop.permute.xlu1 %1731  ;;  %v1185_v13 = vsel %vm529_vm13, %v1183_v38, %v1153_v12  ;;  %v4089_v38 = vperm.slane %v3805_v4, %v3167_v17  ;;  %v4650_v12 = vld [vmem:[#allocation28_spill] sm:$0xff] }
 0x1bb   : > { %v4067_v8 = vsel %vm520_vm10, %v1771_v57, %v1732_v16  ;;  %v1723_v34 = vrot.slane %v4650_v12, 4  ;;  %v4103_v4 = vsel %vm532_vm14, %v1185_v13, %v1156_v50  ;;  %v4137_v12 = vperm.slane %v3835_v63, %v3167_v17 }
 0x1bc   : > { %v1262_v57 = vrot.slane %v4089_v38, 4  ;;  %v1314_v63 = vrot.slane %v4051_v20, 4  ;;  %v4161_v20 = vperm.slane %v2058_v45, %v3167_v17  ;;  %v4656_v45 = vld [vmem:[#allocation19_spill] sm:$0xff] }
 0x1bd   : > { %v1724_v16 = vsel %vm370_vm8, 0, %v1723_v34  ;;  %v1868_v34 = vsel %vm370_vm8, 0, %v1867_v49 }
 0x1be   : > { %v1263_v14 = vsel %vm370_vm8, 0, %v1262_v57 }
 0x1bf   : > { %1525 = vrot.lane.b32.xlu2 %v1511_v5, %s2818_s5  ;;  %2155 = vrot.lane.b32.xlu0 %v2124_v59, %s2818_s5  ;;  %v4651_v5 = vld [vmem:[#allocation27_spill] sm:$0xff] }
 0x1c0   : > { %1543 = vrot.lane.b32.xlu1 %v1463_v54, %s2819_s13  ;;  %v4652_v54 = vld [vmem:[#allocation25_spill] sm:$0xff] }
 0x1c1   : > { %v690_v40 = vpop.permute.xlu2 %689  ;;  %v1750_v0 = vpop.permute.xlu0 %1749  ;;  %v1719_v21 = vrot.slane %v4652_v54, 4 }
 0x1c2   : > { %v696_v58 = vpop.permute.xlu1 %695  ;;  %v1786_v59 = vsel %vm516_vm9, %v4651_v5, %v1750_v0  ;;  %v4654_v5 = vld [vmem:[#allocation30_spill] sm:$0xff] }
 0x1c3   : > { %v1720_v0 = vsel %vm370_vm8, 0, %v1719_v21 }
 0x1c7   : > { %2134 = vrot.lane.b32.xlu2 %v2120_v31, %s2818_s5  ;;  %1528 = vrot.lane.b32.xlu0 %v4084_v9, %s2814_s26 }
 0x1c8   : > { %1322 = vrot.lane.b32.xlu1 %v1259_v27, %s2819_s13  ;;  %v4132_v27 = vsel %vm520_vm10, %v1786_v59, %v4009_v46 }
 0x1c9   : > { %v4096_v62 = vpop.permute.xlu2 %716  ;;  %v702_v19 = vpop.permute.xlu0 %701 }
 0x1ca   : > { %v4098_v36 = vpop.permute.xlu1 %895 }
 0x1cf   : > { %1755 = vrot.lane.b32.xlu0 %v1724_v16, %s2818_s5  ;;  %1343 = vrot.lane.b32.xlu2 %v1263_v14, %s2819_s13  ;;  %v1871_v14 = vrot.slane %v4137_v12, 4 }
 0x1d0   : > { %1549 = vrot.lane.b32.xlu1 %v4108_v10, %s2814_s26 }
 0x1d1   : > { %v890_v50 = vpop.permute.xlu2 %889  ;;  %v902_v13 = vpop.permute.xlu0 %901  ;;  %v1872_v49 = vsel %vm370_vm8, 0, %v1871_v14 }
 0x1d2   : > { %v687_v35 = vpop.permute.xlu1 %686 }
 0x1d3   : > { %v729_v11 = vsel %vm516_vm9, %v4653_v26, %v687_v35 }
 0x1d4   : > { %v731_v31 = vsel %vm520_vm10, %v729_v11, %v690_v40  ;;  %v1315_v11 = vsel %vm370_vm8, 0, %v1314_v63  ;;  %v1923_v63 = vrot.slane %v4031_v6, 4 }
 0x1d7   : > { %2137 = vrot.lane.b32.xlu0 %v4128_v7, %s2814_s26  ;;  %1734 = vrot.lane.b32.xlu2 %v1720_v0, %s2818_s5 }
 0x1d8   : > { %1931 = vrot.lane.b32.xlu1 %v1868_v34, %s2819_s13  ;;  %v4178_v34 = vperm.slane %v3827_v1, %v3167_v17 }
 0x1d9   : > { %v4145_v40 = vpop.permute.xlu2 %916  ;;  %v693_v46 = vpop.permute.xlu0 %692 }
 0x1da   : > { %v887_v57 = vpop.permute.xlu1 %886  ;;  %v733_v16 = vsel %vm523_vm11, %v731_v31, %v693_v46  ;;  %v4655_v31 = vld [vmem:[#allocation18_spill] sm:$0xff] }
 0x1db   : > { %v929_v59 = vsel %vm516_vm9, %v4654_v5, %v887_v57  ;;  %v735_v35 = vsel %vm526_vm12, %v733_v16, %v696_v58  ;;  %v4174_v0 = vperm.slane %v4655_v31, %v3167_v17  ;;  %v4240_v31 = vperm.slane %v3904_v24, %v3167_v17 }
 0x1dc   : > { %v737_v54 = vsel %vm529_vm13, %v735_v35, %v4040_v51  ;;  %v931_v21 = vsel %vm520_vm10, %v929_v59, %v890_v50  ;;  %v4195_v59 = vperm.slane %v3867_v43, %v3167_v17  ;;  %v1924_v35 = vsel %vm370_vm8, 0, %v1923_v63 }
 0x1dd   : > { %v739_v26 = vsel %vm532_vm14, %v737_v54, %v702_v19  ;;  %v1310_v19 = vrot.slane %v3957_v29, 4  ;;  %v4200_v54 = vperm.slane %v4656_v45, %v3167_v17 }
 0x1df   : > { %1346 = vrot.lane.b32.xlu0 %v1315_v11, %s2818_s5  ;;  %1952 = vrot.lane.b32.xlu2 %v1872_v49, %s2819_s13  ;;  %v1311_v25 = vsel %vm370_vm8, 0, %v1310_v19  ;;  %v4235_v19 = vperm.slane %v3908_v15, %v3167_v17 }
 0x1e0   : > { %2158 = vrot.lane.b32.xlu1 %v4161_v20, %s2814_s26 }
 0x1e1   : > { %v708_v48 = vpop.permute.xlu2 %707  ;;  %v4168_v51 = vpop.permute.xlu0 %719 }
 0x1e2   : > { %v705_v58 = vpop.permute.xlu1 %704  ;;  %v744_v15 = vsel %vm516_vm9, %v3780_v47, %v708_v48  ;;  %v4259_v47 = vperm.slane %v3887_v61, %v3167_v17  ;;  %v4657_v48 = vld [vmem:[#allocation20_spill] sm:$0xff] }
 0x1e3   : > { %v741_v50 = vsel %vm535_vm15, %v739_v26, %v705_v58  ;;  %v4218_v26 = vperm.slane %v3858_v28, %v3167_v17  ;;  %v1464_v58 = vrot.slane %v4108_v10, 4 }
 0x1e7   : > { %1737 = vrot.lane.b32.xlu0 %v4174_v0, %s2814_s26  ;;  %1325 = vrot.lane.b32.xlu2 %v1311_v25, %s2818_s5 }
 0x1e8   : > { %1531 = vrot.lane.b32.xlu1 %v4178_v34, %s2815_s14 }
 0x1e9   : > { %v908_v29 = vpop.permute.xlu2 %907  ;;  %v893_v46 = vpop.permute.xlu0 %892 }
 0x1ea   : > { %v905_v57 = vpop.permute.xlu1 %904  ;;  %v933_v16 = vsel %vm523_vm11, %v931_v21, %v893_v46  ;;  %v4214_v21 = vperm.slane %v3854_v55, %v3167_v17 }
 0x1eb   : > { %v935_v1 = vsel %vm526_vm12, %v933_v16, %v4098_v36  ;;  %v1919_v36 = vrot.slane %v3776_v3, 4  ;;  %v2209_v16 = vrot.slane %v4017_v33, 2 }
 0x1ec   : > { %v937_v14 = vsel %vm529_vm13, %v935_v1, %v4061_v39  ;;  %v1460_v1 = vrot.slane %v4084_v9, 4  ;;  %v944_v9 = vsel %vm516_vm9, %v3850_v37, %v908_v29  ;;  %v4285_v37 = vperm.slane %v3933_v32, %v3167_v17 }
 0x1ed   : > { %v939_v5 = vsel %vm532_vm14, %v937_v14, %v902_v13  ;;  %v2201_v13 = vrot.slane %v741_v50, 6  ;;  %v1920_v11 = vsel %vm370_vm8, 0, %v1919_v36  ;;  %v1465_v50 = vsel %vm370_vm8, 0, %v1464_v58  ;;  %v4658_v58 = vld [vmem:[#allocation21_spill] sm:$0xff] }
 0x1ee   : > { %v1461_v33 = vsel %vm370_vm8, 0, %v1460_v1  ;;  %v1512_v32 = vrot.slane %v4178_v34, 4 }
 0x1ef   : > { %1955 = vrot.lane.b32.xlu0 %v1924_v35, %s2818_s5  ;;  %1552 = vrot.lane.b32.xlu2 %v4195_v59, %s2815_s14  ;;  %v2225_v3 = vsel %vm2223_vm0, %v3962_v23, %v2201_v13  ;;  %v941_v23 = vsel %vm535_vm15, %v939_v5, %v905_v57  ;;  %v4263_v57 = vperm.slane %v4657_v48, %v3167_v17 }
 0x1f0   : > { %1758 = vrot.lane.b32.xlu1 %v4200_v54, %s2814_s26  ;;  %v2205_v46 = vrot.slane %v941_v23, 4 }
 0x1f1   : > { %v4207_v6 = vpop.permute.xlu2 %725  ;;  %v4209_v39 = vpop.permute.xlu0 %919 }
 0x1f2   : > { %v2129_v43 = vpop.permute.xlu1 %2128  ;;  %v2230_v14 = vsel %vm2228_vm2, %v2225_v3, %v2205_v46 }
 0x1f3   : > { %v4255_v35 = vsel %vm2233_vm3, %v2230_v14, %v2209_v16  ;;  %v2171_v45 = vsel %vm516_vm9, %v3878_v52, %v2129_v43  ;;  %v4310_v14 = vperm.slane %v3927_v44, %v3167_v17  ;;  %v1673_v44 = vrot.slane %v4200_v54, 4 }
 0x1f5   : > { %v1674_v54 = vsel %vm370_vm8, 0, %v1673_v44 }
 0x1f7   : > { %1328 = vrot.lane.b32.xlu0 %v4214_v21, %s2814_s26  ;;  %1934 = vrot.lane.b32.xlu2 %v1920_v11, %s2818_s5  ;;  %v2073_v11 = vrot.slane %v4161_v20, 4 }
 0x1f8   : > { %2140 = vrot.lane.b32.xlu1 %v4218_v26, %s2815_s14 }
 0x1f9   : > { %v4228_v55 = vpop.permute.xlu2 %925  ;;  %v4230_v49 = vpop.permute.xlu0 %1928  ;;  %v2074_v23 = vsel %vm370_vm8, 0, %v2073_v11 }
 0x1fa   : > { %v723_v28 = vpop.permute.xlu1 %722 }
 0x1ff   : > { %1555 = vrot.lane.b32.xlu0 %v1465_v50, %s2816_s18  ;;  %2161 = vrot.lane.b32.xlu2 %v4235_v19, %s2815_s14  ;;  %v4280_v50 = vperm.slane %v4658_v58, %v3167_v17  ;;  %v4349_v58 = vperm.slane %v3946_v41, %v3167_v17 }
 0x200   : > { %1349 = vrot.lane.b32.xlu1 %v4240_v31, %s2814_s26 }
 0x201   : > { %v2150_v10 = vpop.permute.xlu2 %2149  ;;  %v711_v25 = vpop.permute.xlu0 %710 }
 0x202   : > { %v923_v24 = vpop.permute.xlu1 %922  ;;  %v746_v63 = vsel %vm520_vm10, %v744_v15, %v711_v25  ;;  %v2186_v52 = vsel %vm516_vm9, %v4034_v2, %v2150_v10  ;;  %v2069_v25 = vrot.slane %v4128_v7, 4  ;;  %v1513_v10 = vsel %vm370_vm8, 0, %v1512_v32 }
 0x203   : > { %v2125_v32 = vrot.slane %v4235_v19, 4 }
 0x204   : > { %v2070_v34 = vsel %vm370_vm8, 0, %v2069_v25 }
 0x207   : > { %1937 = vrot.lane.b32.xlu0 %v4259_v47, %s2814_s26  ;;  %1534 = vrot.lane.b32.xlu2 %v1461_v33, %s2816_s18  ;;  %v1516_v33 = vrot.slane %v4195_v59, 4 }
 0x208   : > { %1740 = vrot.lane.b32.xlu1 %v4263_v57, %s2815_s14 }
 0x209   : > { %v1520_v5 = vpop.permute.xlu2 %1519  ;;  %v911_v61 = vpop.permute.xlu0 %910  ;;  %v1517_v59 = vsel %vm370_vm8, 0, %v1516_v33 }
 0x20a   : > { %v2132_v36 = vpop.permute.xlu1 %2131  ;;  %v946_v13 = vsel %vm520_vm10, %v944_v9, %v911_v61 }
 0x20b   : > { %v2173_v3 = vsel %vm520_vm10, %v2171_v45, %v2132_v36 }
 0x20f   : > { %2164 = vrot.lane.b32.xlu0 %v2074_v23, %s2816_s18  ;;  %1761 = vrot.lane.b32.xlu2 %v4280_v50, %s2815_s14 }
 0x210   : > { %1958 = vrot.lane.b32.xlu1 %v4285_v37, %s2814_s26 }
 0x211   : > { %v2153_v20 = vpop.permute.xlu2 %2152  ;;  %v4294_v29 = vpop.permute.xlu0 %1319 }
 0x212   : > { %v714_v43 = vpop.permute.xlu1 %713  ;;  %v4297_v15 = vsel %vm520_vm10, %v2186_v52, %v2153_v20  ;;  %v1362_v44 = vsel %vm516_vm9, %v4077_v53, %v4294_v29 }
 0x213   : > { %v748_v46 = vsel %vm523_vm11, %v746_v63, %v714_v43  ;;  %v1264_v43 = vrot.slane %v4240_v31, 4  ;;  %v1869_v31 = vrot.slane %v4259_v47, 4 }
 0x214   : > { %v750_v16 = vsel %vm526_vm12, %v748_v46, %v4096_v62  ;;  %v1562_v62 = vsel %vm516_vm9, %v3968_v42, %v1520_v5  ;;  %v4332_v5 = vperm.slane %v3942_v60, %v3167_v17  ;;  %v2121_v60 = vrot.slane %v4218_v26, 4 }
 0x215   : > { %v752_v1 = vsel %vm529_vm13, %v750_v16, %v4168_v51  ;;  %v1265_v16 = vsel %vm370_vm8, 0, %v1264_v43 }
 0x216   : > { %v754_v2 = vsel %vm532_vm14, %v752_v1, %v723_v28  ;;  %v2122_v11 = vsel %vm370_vm8, 0, %v2121_v60  ;;  %v2126_v1 = vsel %vm370_vm8, 0, %v2125_v32 }
 0x217   : > { %1537 = vrot.lane.b32.xlu0 %v1513_v10, %s2817_s10  ;;  %2143 = vrot.lane.b32.xlu2 %v2070_v34, %s2816_s18  ;;  %v756_v26 = vsel %vm535_vm15, %v754_v2, %v4207_v6  ;;  %v4369_v6 = vperm.slane %v3954_v56, %v3167_v17 }
 0x218   : > { %1331 = vrot.lane.b32.xlu1 %v4310_v14, %s2815_s14  ;;  %v2202_v52 = vrot.slane %v756_v26, 6 }
 0x219   : > { %v1526_v7 = vpop.permute.xlu2 %1525  ;;  %v1523_v51 = vpop.permute.xlu0 %1522 }
 0x21a   : > { %v914_v28 = vpop.permute.xlu1 %913  ;;  %v1564_v63 = vsel %vm520_vm10, %v1562_v62, %v1523_v51  ;;  %v2227_v25 = vsel %vm2223_vm0, %v4014_v18, %v2202_v52  ;;  %v1260_v62 = vrot.slane %v4214_v21, 4 }
 0x21b   : > { %v948_v48 = vsel %vm523_vm11, %v946_v13, %v914_v28  ;;  %v4324_v9 = vsel %vm523_vm11, %v1564_v63, %v1526_v7  ;;  %v1721_v7 = vrot.slane %v4263_v57, 4  ;;  %v1725_v63 = vrot.slane %v4280_v50, 4 }
 0x21c   : > { %v950_v61 = vsel %vm526_vm12, %v948_v48, %v4145_v40  ;;  %v1261_v28 = vsel %vm370_vm8, 0, %v1260_v62 }
 0x21d   : > { %v952_v42 = vsel %vm529_vm13, %v950_v61, %v4209_v39  ;;  %v1726_v50 = vsel %vm370_vm8, 0, %v1725_v63 }
 0x21e   : > { %v954_v45 = vsel %vm532_vm14, %v952_v42, %v923_v24  ;;  %v1669_v24 = vrot.slane %v4174_v0, 4  ;;  %v1316_v42 = vrot.slane %v4332_v5, 4 }
 0x21f   : > { %1764 = vrot.lane.b32.xlu0 %v1674_v54, %s2816_s18  ;;  %1352 = vrot.lane.b32.xlu2 %v4332_v5, %s2815_s14  ;;  %v956_v18 = vsel %vm535_vm15, %v954_v45, %v4228_v55 }
 0x220   : > { %1558 = vrot.lane.b32.xlu1 %v1517_v59, %s2817_s10  ;;  %v1670_v23 = vsel %vm370_vm8, 0, %v1669_v24  ;;  %v2206_v17 = vrot.slane %v956_v18, 4  ;;  %v1317_v54 = vsel %vm370_vm8, 0, %v1316_v42  ;;  %v1921_v24 = vrot.slane %v4349_v58, 4 }
 0x221   : > { %v2135_v40 = vpop.permute.xlu2 %2134  ;;  %v1541_v36 = vpop.permute.xlu0 %1540 }
 0x222   : > { %v1950_v39 = vpop.permute.xlu1 %1949  ;;  %v4342_v13 = vsel %vm523_vm11, %v2173_v3, %v2135_v40  ;;  %v1577_v56 = vsel %vm516_vm9, %v4057_v30, %v1541_v36  ;;  %v4392_v47 = vsel %vm2228_vm2, %v2227_v25, %v2206_v17  ;;  %v1870_v30 = vsel %vm370_vm8, 0, %v1869_v31  ;;  %v4659_v40 = vld [vmem:[#allocation26_spill] sm:$0xff] }
 0x223   : > { %v1986_v21 = vsel %vm516_vm9, %v4137_v12, %v1950_v39  ;;  %v1873_v12 = vrot.slane %v4285_v37, 4  ;;  %v1116_v36 = vrot.slane %v4659_v40, 4  ;;  %v1312_v39 = vrot.slane %v4310_v14, 4 }
 0x224   : > { %v1922_v26 = vsel %vm370_vm8, 0, %v1921_v24  ;;  %v1971_v14 = vsel %vm516_vm9, %v4115_v22, %v4230_v49 }
 0x225   : > { %v1874_v59 = vsel %vm370_vm8, 0, %v1873_v12 }
 0x227   : > { %2146 = vrot.lane.b32.xlu0 %v2122_v11, %s2817_s10  ;;  %1743 = vrot.lane.b32.xlu2 %v1670_v23, %s2816_s18  ;;  %v1117_v11 = vsel %vm370_vm8, 0, %v1116_v36  ;;  %v1313_v23 = vsel %vm370_vm8, 0, %v1312_v39 }
 0x228   : > { %1940 = vrot.lane.b32.xlu1 %v4349_v58, %s2815_s14 }
 0x229   : > { %v1344_v3 = vpop.permute.xlu2 %1343  ;;  %v1547_v0 = vpop.permute.xlu0 %1546 }
 0x22a   : > { %v1341_v20 = vpop.permute.xlu1 %1340 }
 0x22b   : > { %v1377_v41 = vsel %vm516_vm9, %v4089_v38, %v1341_v20  ;;  %v1925_v20 = vrot.slane %v4369_v6, 4 }
 0x22c   : > { %v4365_v46 = vsel %vm520_vm10, %v1377_v41, %v1344_v3 }
 0x22d   : > { %v1926_v41 = vsel %vm370_vm8, 0, %v1925_v20 }
 0x22f   : > { %1355 = vrot.lane.b32.xlu0 %v1265_v16, %s2816_s18  ;;  %1961 = vrot.lane.b32.xlu2 %v4369_v6, %s2815_s14 }
 0x230   : > { %2167 = vrot.lane.b32.xlu1 %v2126_v1, %s2817_s10 }
 0x231   : > { %v1735_v38 = vpop.permute.xlu2 %1734  ;;  %v2156_v19 = vpop.permute.xlu0 %2155 }
 0x232   : > { %v1544_v2 = vpop.permute.xlu1 %1543  ;;  %v4384_v10 = vsel %vm523_vm11, %v4067_v8, %v1735_v38  ;;  %v2190_v34 = vsel %vm523_vm11, %v4297_v15, %v2156_v19  ;;  %v1722_v8 = vsel %vm370_vm8, 0, %v1721_v7 }
 0x233   : > { %v1579_v55 = vsel %vm520_vm10, %v1577_v56, %v1544_v2 }
 0x234   : > { %v1581_v51 = vsel %vm523_vm11, %v1579_v55, %v1547_v0 }
 0x237   : > { %1943 = vrot.lane.b32.xlu0 %v1870_v30, %s2816_s18  ;;  %1334 = vrot.lane.b32.xlu2 %v1261_v28, %s2816_s18 }
 0x238   : > { %1746 = vrot.lane.b32.xlu1 %v1722_v8, %s2817_s10 }
 0x239   : > { %v1953_v57 = vpop.permute.xlu2 %1952  ;;  %v1529_v15 = vpop.permute.xlu0 %1528 }
 0x23a   : > { %v1323_v48 = vpop.permute.xlu1 %1322  ;;  %v1988_v33 = vsel %vm520_vm10, %v1986_v21, %v1953_v57  ;;  %v1568_v61 = vsel %vm526_vm12, %v4324_v9, %v1529_v15 }
 0x23b   : > { %v1364_v45 = vsel %vm520_vm10, %v1362_v44, %v1323_v48 }
 0x23f   : > { %1358 = vrot.lane.b32.xlu0 %v1317_v54, %s2817_s10  ;;  %1767 = vrot.lane.b32.xlu2 %v1726_v50, %s2817_s10 }
 0x240   : > { %1964 = vrot.lane.b32.xlu1 %v1874_v59, %s2816_s18 }
 0x241   : > { %v1326_v53 = vpop.permute.xlu2 %1325  ;;  %v1756_v29 = vpop.permute.xlu0 %1755 }
 0x242   : > { %v1550_v9 = vpop.permute.xlu1 %1549  ;;  %v1366_v5 = vsel %vm523_vm11, %v1364_v45, %v1326_v53  ;;  %v1790_v37 = vsel %vm523_vm11, %v4132_v27, %v1756_v29 }
 0x243   : > { %v1583_v60 = vsel %vm526_vm12, %v1581_v51, %v1550_v9 }
 0x247   : > { %1158 = vrot.lane.b32.xlu0 %v1117_v11, %s2817_s10  ;;  %1337 = vrot.lane.b32.xlu2 %v1313_v23, %s2817_s10 }
 0x248   : > { %1946 = vrot.lane.b32.xlu1 %v1922_v26, %s2817_s10 }
 0x249   : > { %v1553_v27 = vpop.permute.xlu2 %1552  ;;  %v2138_v3 = vpop.permute.xlu0 %2137 }
 0x24a   : > { %v1932_v0 = vpop.permute.xlu1 %1931  ;;  %v4436_v58 = vsel %vm529_vm13, %v1583_v60, %v1553_v27  ;;  %v2177_v52 = vsel %vm526_vm12, %v4342_v13, %v2138_v3 }
 0x24b   : > { %v1973_v43 = vsel %vm520_vm10, %v1971_v14, %v1932_v0 }
 0x24f   : > { %1967 = vrot.lane.b32.xlu2 %v1926_v41, %s2817_s10 }
 0x251   : > { %v1935_v32 = vpop.permute.xlu2 %1934  ;;  %v1347_v25 = vpop.permute.xlu0 %1346 }
 0x252   : > { %v2159_v16 = vpop.permute.xlu1 %2158  ;;  %v4445_v22 = vsel %vm523_vm11, %v1973_v43, %v1935_v32  ;;  %v4449_v49 = vsel %vm523_vm11, %v4365_v46, %v1347_v25 }
 0x253   : > { %v2192_v13 = vsel %vm526_vm12, %v2190_v34, %v2159_v16 }
 0x259   : > { %v2162_v1 = vpop.permute.xlu2 %2161  ;;  %v1738_v6 = vpop.permute.xlu0 %1737 }
 0x25a   : > { %v1532_v18 = vpop.permute.xlu1 %1531  ;;  %v1777_v38 = vsel %vm526_vm12, %v4384_v10, %v1738_v6  ;;  %v2194_v36 = vsel %vm529_vm13, %v2192_v13, %v2162_v1 }
 0x25b   : > { %v1570_v19 = vsel %vm529_vm13, %v1568_v61, %v1532_v18 }
 0x261   : > { %v1535_v31 = vpop.permute.xlu2 %1534  ;;  %v1956_v17 = vpop.permute.xlu0 %1955 }
 0x262   : > { %v1759_v56 = vpop.permute.xlu1 %1758  ;;  %v1572_v2 = vsel %vm532_vm14, %v1570_v19, %v1535_v31  ;;  %v1990_v62 = vsel %vm523_vm11, %v1988_v33, %v1956_v17 }
 0x263   : > { %v1792_v46 = vsel %vm526_vm12, %v1790_v37, %v1759_v56 }
 0x269   : > { %v1762_v55 = vpop.permute.xlu2 %1761  ;;  %v1329_v7 = vpop.permute.xlu0 %1328 }
 0x26a   : > { %v2141_v34 = vpop.permute.xlu1 %2140  ;;  %v1368_v51 = vsel %vm526_vm12, %v1366_v5, %v1329_v7  ;;  %v1794_v16 = vsel %vm529_vm13, %v1792_v46, %v1762_v55 }
 0x26b   : > { %v2179_v54 = vsel %vm529_vm13, %v2177_v52, %v2141_v34 }
 0x271   : > { %v2144_v30 = vpop.permute.xlu2 %2143  ;;  %v1556_v28 = vpop.permute.xlu0 %1555 }
 0x272   : > { %v1350_v8 = vpop.permute.xlu1 %1349  ;;  %v2181_v50 = vsel %vm532_vm14, %v2179_v54, %v2144_v30  ;;  %v1587_v13 = vsel %vm532_vm14, %v4436_v58, %v1556_v28 }
 0x279   : > { %v1353_v10 = vpop.permute.xlu2 %1352  ;;  %v4459_v21 = vpop.permute.xlu0 %1937 }
 0x27a   : > { %v1741_v57 = vpop.permute.xlu1 %1740 }
 0x27b   : > { %v1779_v52 = vsel %vm529_vm13, %v1777_v38, %v1741_v57  ;;  %v1383_v38 = vsel %vm526_vm12, %v4449_v49, %v1350_v8  ;;  %v1977_v57 = vsel %vm526_vm12, %v4445_v22, %v4459_v21  ;;  %v2254_v21 = vld [vmem:[%s4583_s1] sm:$0xf] }
 0x27c   : > { %v1385_v31 = vsel %vm529_vm13, %v1383_v38, %v1353_v10 }
 0x281   : > { %v1744_v15 = vpop.permute.xlu2 %1743  ;;  %v2165_v63 = vpop.permute.xlu0 %2164 }
 0x282   : > { %v1959_v44 = vpop.permute.xlu1 %1958  ;;  %v2196_v23 = vsel %vm532_vm14, %v2194_v36, %v2165_v63  ;;  %v1781_v43 = vsel %vm532_vm14, %v1779_v52, %v1744_v15 }
 0x283   : > { %v1992_v17 = vsel %vm526_vm12, %v1990_v62, %v1959_v44 }
 0x289   : > { %v1962_v48 = vpop.permute.xlu2 %1961  ;;  %v1538_v61 = vpop.permute.xlu0 %1537 }
 0x28a   : > { %v1332_v33 = vpop.permute.xlu1 %1331  ;;  %v1574_v37 = vsel %vm535_vm15, %v1572_v2, %v1538_v61  ;;  %v1994_v58 = vsel %vm529_vm13, %v1992_v17, %v1962_v48 }
 0x28b   : > { %v1370_v40 = vsel %vm529_vm13, %v1368_v51, %v1332_v33  ;;  %v2213_v39 = vrot.slane %v1574_v37, 6 }
 0x291   : > { %v1335_v42 = vpop.permute.xlu2 %1334  ;;  %v1765_v45 = vpop.permute.xlu0 %1764 }
 0x292   : > { %v1559_v12 = vpop.permute.xlu1 %1558  ;;  %v1372_v60 = vsel %vm532_vm14, %v1370_v40, %v1335_v42  ;;  %v1796_v6 = vsel %vm532_vm14, %v1794_v16, %v1765_v45  ;;  %v2300_v40 = vld [vmem:[#allocation4] sm:$0xff] }
 0x293   : > { %v1589_v1 = vsel %vm535_vm15, %v1587_v13, %v1559_v12 }
 0x294   : > { %v2214_v56 = vrot.slane %v1589_v1, 6 }
 0x299   : > { %v1768_v59 = vpop.permute.xlu2 %1767  ;;  %v2147_v53 = vpop.permute.xlu0 %2146 }
 0x29a   : > { %v1941_v29 = vpop.permute.xlu1 %1940  ;;  %v2183_v9 = vsel %vm535_vm15, %v2181_v50, %v2147_v53  ;;  %v1798_v19 = vsel %vm535_vm15, %v1796_v6, %v1768_v59 }
 0x29b   : > { %v2259_v5 = vsel %vm2223_vm0, %v2183_v9, 0  ;;  %v2218_v55 = vrot.slane %v1798_v19, 4  ;;  %v1979_v15 = vsel %vm529_vm13, %v1977_v57, %v1941_v29 }
 0x29c   : > { %2268 = vmatpush.bf16.msra.mxu0 %v2259_v5  ;;  %v2294_v5 = vld [vmem:[#allocation3] sm:$0xff] }
 0x2a1   : > { %v1338_v24 = vpop.permute.xlu2 %1337  ;;  %v1356_v11 = vpop.permute.xlu0 %1355 }
 0x2a2   : > { %v2168_v26 = vpop.permute.xlu1 %2167  ;;  %v1374_v27 = vsel %vm535_vm15, %v1372_v60, %v1338_v24  ;;  %v1387_v2 = vsel %vm532_vm14, %v1385_v31, %v1356_v11 }
 0x2a3   : > { %v2241_v3 = vsel %vm2223_vm0, %v1374_v27, %v2213_v39  ;;  %v2198_v14 = vsel %vm535_vm15, %v2196_v23, %v2168_v26 }
 0x2a4   : > { %v2261_v0 = vsel %vm2223_vm0, %v2198_v14, 0 }
 0x2a5   : > { %2281 = vmatpush.bf16.msra.mxu1 %v2261_v0 }
 0x2a9   : > { %v1944_v20 = vpop.permute.xlu0 %1943  ;;  %v1968_v51 = vpop.permute.xlu2 %1967 }
 0x2aa   : > { %v1747_v41 = vpop.permute.xlu1 %1746  ;;  %v1981_v44 = vsel %vm532_vm14, %v1979_v15, %v1944_v20 }
 0x2ab   : > { %v1783_v32 = vsel %vm535_vm15, %v1781_v43, %v1747_v41 }
 0x2ac   : > { %v2217_v25 = vrot.slane %v1783_v32, 4 }
 0x2ae   : > { %v2245_v18 = vsel %vm2228_vm2, %v2241_v3, %v2217_v25 }
 0x2b1   : > { %v1359_v46 = vpop.permute.xlu0 %1358 }
 0x2b2   : > { %v1965_v7 = vpop.permute.xlu1 %1964  ;;  %v1389_v34 = vsel %vm535_vm15, %v1387_v2, %v1359_v46 }
 0x2b3   : > { %v1996_v30 = vsel %vm532_vm14, %v1994_v58, %v1965_v7  ;;  %v2243_v49 = vsel %vm2223_vm0, %v1389_v34, %v2214_v56 }
 0x2b4   : > { %v1998_v28 = vsel %vm535_vm15, %v1996_v30, %v1968_v51  ;;  %v2247_v8 = vsel %vm2228_vm2, %v2243_v49, %v2218_v55 }
 0x2b5   : > { %v2222_v62 = vrot.slane %v1998_v28, 2 }
 0x2b7   : > { %v2252_v10 = vsel %vm2233_vm3, %v2247_v8, %v2222_v62 }
 0x2b8   : > { %2282 = vmatpush.bf16.msra.mxu1 %v2252_v10 }
 0x2b9   : > { %v1159_v63 = vpop.permute.xlu0 %1158 }
 0x2ba   : > { %v1947_v48 = vpop.permute.xlu1 %1946  ;;  %v1189_v61 = vsel %vm535_vm15, %v4103_v4, %v1159_v63 }
 0x2bb   : > { %v1983_v33 = vsel %vm535_vm15, %v1981_v44, %v1947_v48  ;;  %v2210_v42 = vrot.slane %v1189_v61, 2 }
 0x2bc   : > { %v2221_v45 = vrot.slane %v1983_v33, 2 }
 0x2bd   : > { %v2238_v12 = vsel %vm2233_vm3, %v4392_v47, %v2210_v42 }
 0x2be   : > { %v2249_v22 = vsel %vm2233_vm3, %v2245_v18, %v2221_v45  ;;  %2283 = vmatpush.bf16.msra.mxu1 %v2238_v12 }
 0x2bf   : > { %2269 = vmatpush.bf16.msra.mxu0 %v2249_v22 }
 0x2c1   : > { %2506 = vmatmul.msk.bf16.vlgmr.msra.gmra.mxu1 %vm2255_vm4, %v2254_v21 }
 0x2c3   : > { %2270 = vmatpush.bf16.msra.mxu0 %v4255_v35 }
 0x2c6   : > { %2505 = vmatmul.msk.bf16.vlgmr.msra.gmra.mxu0 %vm2255_vm4, %v2254_v21 }
 0x33e   : > { %v2285_v4 = vpop.f32.mrf.mxu1 }
 0x33f   : > { %2293 = vst [vmem:[%s2291_s28 + $0x8] sm:$0xff] %v2285_v4  ;;  %v2302_v54 = vmul.f32 %v2285_v4, %v2285_v4 }
 0x343   : > { %v2272_v50 = vpop.f32.mrf.mxu0 }
 0x344   : > { %2292 = vst [vmem:[%s2291_s28] sm:$0xff] %v2272_v50  ;;  %v2295_v47 = vadd.f32 %v2285_v4, %v2272_v50  ;;  %v2301_v59 = vmul.f32 %v2272_v50, %v2272_v50 }
 0x346   : > { %2296 = vadd.xlane.f32.xlu1 %v2295_v47  ;;  %v2287_v53 = vpop.f32.mrf.mxu1  ;;  %v2303_v29 = vadd.f32 %v2302_v54, %v2301_v59 }
 0x348   : > { %2304 = vadd.xlane.f32.xlu2 %v2303_v29 }
 0x34b   : > { %v2274_v9 = vpop.f32.mrf.mxu0 }
 0x3b9   : > { %v2297_v37 = vpop.xlane.xlu1 %2296 }
 0x3ba   : > { %v2298_v36 = vadd.f32 %v2297_v37, %v2294_v5 }
 0x3bb   : > { %v2305_v35 = vpop.xlane.xlu2 %2304 }
 0x3bc   : > { %2299 = vst.msk [vmem:[#allocation3] sm:$0xff] %vm290_vm1, %v2298_v36  ;;  %v2306_v39 = vadd.f32 %v2305_v35, %v2300_v40 }
 0x3be   : > { %2307 = vst.msk [vmem:[#allocation4] sm:$0xff] %vm290_vm1, %v2306_v39 }
 0x3bf PF: > { %p2308_p11 = scmp.eq.s32.totalorder %s2790_s22, 1 }
 0x3c1   : > { %p2309_p13 = pnand %p2308_p11, %p243_p9 }
 0x3c3   : > { %2312 = sbr.rel (%p2309_p13) target bundleno = 1016 (0x3f8), region = 52 }
 0x3c8   : > { %v2820_v60 = vmov 512.0   ;;  %v2313_v27 = vld [vmem:[#allocation3] sm:$0xff]  ;;  %v2322_v14 = vld [vmem:[#allocation4] sm:$0xff]  ;;  %vm2339_vm8 = vcmask 7168  }
 0x3c9   : > { %2645 = vrcp.f32 %v2820_v60  ;;  %v2337_v6 = vld [vmem:[%s4584_s2] sm:$0xff] }
 0x3ca   : > { %v2341_v17 = vld [vmem:[%s4585_s3] sm:$0xff] }
 0x3cf   : > { %v2646_v24 = vpop.eup %2645 }
 0x3d0   : > { %v2315_v11 = vmul.f32 512.0, %v2646_v24  ;;  %vm2319_vm5 = vweird.f32 %v2646_v24 }
 0x3d2   : > { %v2316_v23 = vsub.f32 1.0, %v2315_v11 }
 0x3d4   : > { %v2317_v26 = vmul.f32 %v2646_v24, %v2316_v23 }
 0x3d6   : > { %v2318_v3 = vadd.f32 %v2646_v24, %v2317_v26 }
 0x3d8   : > { %v2320_v0 = vsel %vm2319_vm5, %v2646_v24, %v2318_v3 }
 0x3d9   : > { %v2321_v52 = vmul.f32 %v2320_v0, %v2313_v27  ;;  %v2323_v20 = vmul.f32 %v2322_v14, %v2320_v0 }
 0x3db   : > { %v2324_v43 = vmul.f32 %v2321_v52, %v2321_v52  ;;  %v2343_v38 = vmul.f32 %v2337_v6, %v2321_v52 }
 0x3dd   : > { %v2325_v41 = vsub.f32 %v2323_v20, %v2324_v43 }
 0x3df   : > { %v2326_v32 = vadd.f32 1e-05, %v2325_v41 }
 0x3e1   : > { %2647 = vrsqrt.f32 %v2326_v32  ;;  %vm2333_vm1 = vweird.f32 %v2326_v32 }
 0x3e7   : > { %v2648_v25 = vpop.eup %2647 }
 0x3e8   : > { %v2328_v16 = vmul.f32 %v2648_v25, %v2326_v32  ;;  %vm2334_vm6 = vweird.f32 %v2648_v25 }
 0x3e9   : > { %vm2335_vm7 = vmor %vm2333_vm1, %vm2334_vm6 }
 0x3ea   : > { %v2329_v13 = vmul.f32 %v2648_v25, %v2328_v16 }
 0x3ec   : > { %v2330_v1 = vmul.f32 0.5, %v2329_v13 }
 0x3ee   : > { %v2331_v18 = vsub.f32 1.5, %v2330_v1 }
 0x3f0   : > { %v2332_v19 = vmul.f32 %v2648_v25, %v2331_v18 }
 0x3f2   : > { %v2336_v31 = vsel %vm2335_vm7, %v2648_v25, %v2332_v19 }
 0x3f3   : > { %v2338_v56 = vmul.f32 %v2337_v6, %v2336_v31  ;;  %v2344_v2 = vmul.f32 %v2343_v38, %v2336_v31 }
 0x3f5   : > { %2340 = vst.msk [vmem:[#allocation5] sm:$0xff] %vm2339_vm8, %v2338_v56  ;;  %v2345_v46 = vsub.f32 %v2341_v17, %v2344_v2 }
 0x3f7   : > { %2346 = vst.msk [vmem:[#allocation6] sm:$0xff] %vm2339_vm8, %v2345_v46 }
 0x3f8 PF: > { %p2509_p0 = scmp.ne.s32.totalorder %s2790_s22, 1 }
 0x3f9   : > { %s2523_s14 = sshll.u32 (!%p2509_p0), %s2786_s21, 4 }
 0x3fa   : > { %2349 = sbr.rel (%p2509_p0) target bundleno = 1154 (0x482), region = 56  ;;  %s2352_s18 = scalar_lea.vmem (!%p2509_p0), [#allocation2], %s2523_s14 }
 0x3ff   : > { %v2355_v58 = vld [vmem:[#allocation5] sm:$0xff]  ;;  %v2821_v55 = vmov 0   ;;  %v2363_v7 = vld [vmem:[#allocation6] sm:$0xff]  ;;  %v2353_v51 = vld [vmem:[%s2352_s18] sm:$0xff] }
 0x400   : > { %2649 = vset.pattern.permute.xlu0 %v2821_v55  ;;  %v2354_v30 = vld [vmem:[%s2352_s18 + $0x8] sm:$0xff] }
 0x401   : > { %2358 = vperm.xlu0 %2649, %v2355_v58  }
 0x409   : > { %2366 = vperm.xlu0 %2649, %v2363_v7  }
 0x473   : > { %v2359_v34 = vpop.permute.xlu0 %2358 }
 0x474   : > { %v2361_v49 = vmul.f32 %v2359_v34, %v2353_v51  ;;  %v2362_v28 = vmul.f32 %v2359_v34, %v2354_v30 }
 0x47b   : > { %v2367_v8 = vpop.permute.xlu0 %2366 }
 0x47c   : > { %v2369_v62 = vadd.f32 %v2367_v8, %v2361_v49  ;;  %v2370_v10 = vadd.f32 %v2367_v8, %v2362_v28 }
 0x47e   : > { %v2371_v57 = vmax.f32 %v2369_v62, 0.0  ;;  %v2372_v15 = vmax.f32 %v2370_v10, 0.0 }
 0x480   : > { %2373 = vst [vmem:[%s2976_s27] sm:$0xff] %v2371_v57 }
 0x481   : > { %2374 = vst [vmem:[%s2976_s27 + $0x8] sm:$0xff] %v2372_v15 }
 0x482 PF: > { %s2383_s10 = smul.u32 %s2786_s21, %s2790_s22  ;;  %s2390_s5 = sshll.u32 %s2976_s27, 4  ;;  %s2391_s5 = int_to_ptr.vmem [resolvable:$true] %s2390_s5 }
 0x483   : > { %s2376_s7 = scalar_lea.sflag [#allocation9], %s235_s29  ;;  %s2700_s22 = scalar_lea.hbm %s4586_s4, 32 }
 0x484   : > { %s2524_s13 = sshll.u32 %s2383_s10, 4 }
 0x485   : > { %s2388_s23 = scalar_lea.hbm %s4586_s4, %s2524_s13 }
 0x486   : > { %s2392_s28 = sshll.u32 %s2388_s23, 4  ;;  %s2393_s28 = int_to_ptr.hbm [resolvable:$true] %s2392_s28 }
 0x487   : > { %s2694_s8 = sshra.s32 %s2393_s28, 4  ;;  %s2695_s8 = int_to_ptr.hbm [resolvable:$true] %s2694_s8 }
 0x488   : > { %s2696_s9 = scalar_lea.hbm %s2695_s8, 16  ;;  %p2701_p6 = scmp.lt.s32.totalorder %s2695_s8, %s4586_s4 }
 0x489   : > { %p2697_p1 = scmp.ne.s32.totalorder %s2695_s8, %s2696_s9  ;;  %p2702_p8 = scmp.lt.s32.totalorder %s2700_s22, %s2696_s9 }
 0x48b   : > { %p2698_p3 = pnand %p2697_p1, %p2942_p12  ;;  %p2703_p5 = por %p2702_p8, %p2701_p6 }
 0x48d   : > { %p2699_p4 = pneg %p2698_p3 }
 0x48f   : > { %p2704_p9 = pnand %p2703_p5, %p2699_p4 }
 0x491   : > { %2707 = shalt.err (!%p2704_p9)
}
 0x492   : > { %2527 = dma.vmem_to_hbm [thread:$0]  (%p2942_p12), %s2391_s5, 256, %s2393_s28, %s2376_s7  }
 0x493 PF: > { %p2538_p10 = scmp.ge.s32.totalorder %s2802_s25, 2  ;;  %s2404_s29 = sand.u32 1, %s2762_s15  }
 0x494   : > { %s2405_s18 = scalar_lea.sflag [#allocation9], %s2404_s29 }
 0x495   : > { %p2534_p7 = pnand %p2538_p10, %p2952_p2 }
 0x497   : > { %p2535_p11 = pneg %p2534_p7 }
 0x499   : > { %2757 = dma.done.wait (%p2535_p11), %s2405_s18, 256  }
 0x49a   : > { %2759 = vsyncadd (%p2535_p11), %s2405_s18, 4294967040  ;;  %s20_s25 = sadd.s32 1, %s2802_s25   ;;  %s4660_s24 = sld [smem:[#allocation17_spill]] }
 0x49b   : > { %p17_p13 = scmp.ge.s32.totalorder %s20_s25, 6   ;;  %s4661_s21 = sld [smem:[#allocation13_spill]] }
 0x49c   : > { %s4662_s22 = sld [smem:[#allocation14_spill]]  ;;  %s4665_s15 = smov %s2766_s16 }
 0x49d   : > { %s4663_s23 = sld [smem:[#allocation15_spill]]  ;;  %s4666_s16 = smov %s2770_s17 }
 0x49e   : > { %s4664_s10 = sld [smem:[#allocation16_spill]]  ;;  %s4667_s17 = smov %s2937_s30 }
 0x49f   : > { %s4668_s18 = smov %s2778_s19  ;;  %s4669_s19 = smov %s2782_s20 }
 0x4a0   : > { %s4670_s20 = smov %s4660_s24  ;;  %19 = sbr.rel (!%p17_p13) target bundleno = 9 (0x9), region = 99 }
 0x4a4   : > { %s4671_s24 = smov %s4664_s10 }
 0x4a5   :  { %2411 = vsyncpa [#allocation8], 1 }
 0x4a6   :  { %2413 = vsyncpa [#allocation8 + $0x1], 1 }
 0x4a7   :  { %2414 = vsyncpa [#allocation9], 1 }
 0x4a8   :  { %2416 = vsyncpa [#allocation9 + $0x1], 1 }

</bundles_post_ra>
